<compile_context>
chip_gen: v6e
topology: v6e:2x2x1
jax: 0.10.0
libtpu: 0.0.40
codegen_flags: <defaults>
</compile_context>

<pallas_src>
import numpy as np
import jax
import jax.numpy as jnp
from jax.experimental import pallas as pl
from jax.experimental.pallas import tpu as pltpu

# --- small, module-consistent hyperparameters -------------------------------
N_BATCH = 2
C_IN = 4
C_OUT = 16
COFF = 4
NUM_SUBSET = 3
T = 8
V = 16
EPS = 1e-5                       # BatchNorm eps (PyTorch default)


# --- Pallas kernel -----------------------------------------------------------
def make_gcn_kernel(n_batch, c_in, c_out, ci, ns, t_dim, v_dim, has_down,
                    a_row, bt_row):
    TC = t_dim * c_in
    NV = n_batch * v_dim
    RT = 2 * ns * ci * t_dim          # stacked conv_a|conv_b output (chan, t) columns
    CIT = ci * t_dim
    NSC = ns * c_in
    inv_scale = 1.0 / CIT

    def kernel(xp_ref, xcd_ref, ws_ref, fs_ref, o_ref):
        # ---- unpack packed operands (static slices, loaded once) -----------
        x_r = xp_ref[0:TC, 0:NV]               # (T*C, N*V) bf16, rows (t,c), lanes (n,v)
        x_rt = xp_ref[TC:TC + NV, 0:TC]        # (N*V, T*C) bf16, rows (n,v), lanes (t,c)
        wabt = ws_ref[0:TC, 0:RT]              # kron'd conv_a|conv_b weights (bf16)
        w_tail = ws_ref[TC:TC + c_out, 0:NSC + c_in]
        wds = w_tail[:, 0:NSC]                 # BN-folded stacked conv_d (c_out, ns*c_in)
        bias_ab = fs_ref[0:1, 0:RT]            # conv_a|conv_b bias per (chan, t) column
        a_sub = [fs_ref[a_row + i * v_dim:a_row + (i + 1) * v_dim, 0:v_dim]
                 for i in range(ns)]           # (A + PA)[i], f32 (V, V), loaded once
        btot = fs_ref[bt_row:bt_row + c_out, 0:1]   # fully folded output bias

        # ---- conv_a / conv_b for all subsets & batch elements: ONE matmul ---
        # abt[(n,v), (r,t)] = sum_c Wab[r,c] * x[n,c,t,v] + b[r]
        abt = jnp.dot(x_rt, wabt, preferred_element_type=jnp.float32) + bias_ab

        # ---- attention per (batch, subset); graph matmul fused per batch ----
        z_n = []
        for n in range(n_batch):
            blk = abt[n * v_dim:(n + 1) * v_dim, :]                    # (V, RT) f32
            att_i = []
            for i in range(ns):
                a1 = blk[:, i * CIT:(i + 1) * CIT]                     # (V, CI*T) conv_a
                a2 = blk[:, (ns + i) * CIT:(ns + i + 1) * CIT]         # (V, CI*T) conv_b
                # S[u, w] = (1/(CI*T)) * sum_{k,t} a1[u,(k,t)] * a2[w,(k,t)]
                s = jax.lax.dot_general(a1, a2, (((1,), (1,)), ((), ())),
                                        preferred_element_type=jnp.float32) * inv_scale
                m = jnp.max(s, axis=0, keepdims=True)                  # softmax over dim=-2
                e = jnp.exp(s - m)
                p = e / jnp.sum(e, axis=0, keepdims=True)
                att_i.append(p + a_sub[i])                             # softmax(..) + (A+PA)[i]
            att_all = jnp.concatenate(att_i, axis=1).astype(jnp.bfloat16)   # (V, 3V)
            # graph matmul, all subsets at once: (T*C, V) @ (V, 3V)
            z_n.append(jnp.dot(x_r[:, n * v_dim:(n + 1) * v_dim], att_all,
                               preferred_element_type=jnp.float32))    # (T*C, 3V) f32

        # ---- regroup z to the lane-dense layout consumed by conv_d ----------
        # zcat[(i,c), (n,t,w)] = z_n[n][(t,c), (i,w)]
        zcat = jnp.concatenate(
            [jnp.concatenate(
                [z_n[n][t * c_in:(t + 1) * c_in, i * v_dim:(i + 1) * v_dim]
                 for n in range(n_batch) for t in range(t_dim)], axis=1)
             for i in range(ns)], axis=0).astype(jnp.bfloat16)         # (3*C, N*T*V)

        # ---- fused conv_d (+ folded main BN) + residual + bias + ReLU -------
        y = jnp.dot(wds, zcat, preferred_element_type=jnp.float32)     # (c_out, N*T*V)
        if has_down:
            wdn = w_tail[:, NSC:NSC + c_in]                            # BN-folded down conv
            y = y + jnp.dot(wdn, xcd_ref[...], preferred_element_type=jnp.float32)
        else:
            y = y + xcd_ref[...]                                       # identity residual (f32)
        o_ref[...] = jnp.maximum(y + btot, 0.0)

    return kernel


# --- wrapper -----------------------------------------------------------------
def unit_gcn_pallas(x, params):
    N, C, Tdim, Vdim = x.shape
    NS, CI, _ = params['wa'].shape
    COUT = params['wd'].shape[1]
    TV, NTV = Tdim * Vdim, N * Tdim * Vdim
    TC, NV = Tdim * C, N * Vdim
    RT = 2 * NS * CI * Tdim
    has_down = (C != COUT)

    xf = x.astype(jnp.float32)

    # x in two narrow layouts, packed into one bf16 slab (one DMA):
    #   rows [0, T*C)       : x_r [t*C+c, n*V+v]  -- graph-matmul operand
    #   rows [T*C, T*C+N*V) : x_rt[n*V+v, t*C+c]  -- conv_a/conv_b operand
    x_r = jnp.transpose(xf, (2, 1, 0, 3)).reshape(TC, NV)
    x_rt = jnp.transpose(xf, (0, 3, 2, 1)).reshape(NV, TC)
    LW = max(NV, TC)
    x_pack = jnp.zeros((TC + NV, LW), jnp.float32)
    x_pack = x_pack.at[0:TC, 0:NV].set(x_r).at[TC:TC + NV, 0:TC].set(x_rt)
    x_pack = x_pack.astype(jnp.bfloat16)

    # lane-dense x for the residual / down branch: (C, N*T*V)
    x_cd = jnp.transpose(xf.reshape(N, C, TV), (1, 0, 2)).reshape(C, NTV)
    if has_down:
        x_cd = x_cd.astype(jnp.bfloat16)        # only used through the down matmul
    # else: kept f32 so the identity residual is exact

    # stacked conv_a | conv_b and its kron-transposed form:
    # wabt[t*C+c, r*T+t'] = Wab[r, c] * delta(t, t')
    wab = jnp.concatenate([params['wa'].reshape(NS * CI, C),
                           params['wb'].reshape(NS * CI, C)], axis=0)
    bab = jnp.concatenate([params['ba'].reshape(NS * CI),
                           params['bb'].reshape(NS * CI)], axis=0)
    wabt = jnp.einsum('tu,rc->tcru', jnp.eye(Tdim, dtype=jnp.float32), wab).reshape(TC, RT)

    # main BatchNorm (inference) folded into stacked conv_d weights + one bias
    bn_scale = params['bn_gamma'] / jnp.sqrt(params['bn_var'] + EPS)
    bn_shift = params['bn_beta'] - params['bn_mean'] * bn_scale
    wd_eff = params['wd'] * bn_scale[None, :, None]                      # (NS, COUT, C)
    wds = jnp.transpose(wd_eff, (1, 0, 2)).reshape(COUT, NS * C)
    b_total = bn_scale * jnp.sum(params['bd'], axis=0) + bn_shift
    if has_down:
        dsc = params['down_bn_gamma'] / jnp.sqrt(params['down_bn_var'] + EPS)
        wdn = params['down_w'] * dsc[:, None]                            # BN-folded down conv
        b_total = (b_total + dsc * (params['down_b'] - params['down_bn_mean'])
                   + params['down_bn_beta'])
    else:
        wdn = jnp.zeros((COUT, C), jnp.float32)

    # bf16 weight slab (one DMA): kron'd conv_ab on top, [conv_d | down] below.
    WL = max(RT, NS * C + C)
    w_slab = jnp.zeros((TC + COUT, WL), jnp.float32)
    w_slab = w_slab.at[0:TC, 0:RT].set(wabt)
    w_slab = w_slab.at[TC:TC + COUT, 0:NS * C].set(wds)
    w_slab = w_slab.at[TC:TC + COUT, NS * C:NS * C + C].set(wdn)
    w_slab = w_slab.astype(jnp.bfloat16)

    # f32 slab (one DMA): conv_ab bias row, A + PA, fully folded output bias.
    A_ROW = 8
    BT_ROW = A_ROW + NS * Vdim
    f_slab = jnp.zeros((BT_ROW + COUT, WL), jnp.float32)
    f_slab = f_slab.at[0:1, 0:RT].set(jnp.repeat(bab, Tdim)[None, :])
    f_slab = f_slab.at[A_ROW:BT_ROW, 0:Vdim].set(
        (params['A'] + params['PA']).reshape(NS * Vdim, Vdim))
    f_slab = f_slab.at[BT_ROW:BT_ROW + COUT, 0].set(b_total)

    kernel = make_gcn_kernel(N, C, COUT, CI, NS, Tdim, Vdim, has_down, A_ROW, BT_ROW)

    out = pl.pallas_call(
        kernel,
        out_shape=jax.ShapeDtypeStruct((COUT, NTV), jnp.float32),
        grid_spec=pltpu.PrefetchScalarGridSpec(
            num_scalar_prefetch=0,
            grid=(1,),                         # whole problem in a single grid step
            in_specs=[
                pl.BlockSpec(x_pack.shape, lambda b: (0, 0)),
                pl.BlockSpec(x_cd.shape, lambda b: (0, 0)),
                pl.BlockSpec(w_slab.shape, lambda b: (0, 0)),
                pl.BlockSpec(f_slab.shape, lambda b: (0, 0)),
            ],
            out_specs=pl.BlockSpec((COUT, NTV), lambda b: (0, 0)),
        ),
    )(x_pack, x_cd, w_slab, f_slab)

    return out.reshape(COUT, N, Tdim, Vdim).transpose(1, 0, 2, 3)


# --- deterministic parameter init (mirrors the module's __init__) ------------
def init_params(key, c_in, c_out, num_subset=NUM_SUBSET, coff=COFF, v=V):
    ci = c_out // coff
    ks = jax.random.split(key, 6)
    wa = jax.random.normal(ks[0], (num_subset, ci, c_in), jnp.float32) * np.sqrt(2.0 / ci)
    wb = jax.random.normal(ks[1], (num_subset, ci, c_in), jnp.float32) * np.sqrt(2.0 / ci)
    wd = jax.random.normal(ks[2], (num_subset, c_out, c_in), jnp.float32) * np.sqrt(
        2.0 / (c_out * c_in * 1 * num_subset))                   # conv_branch_init
    A = jax.random.uniform(ks[3], (num_subset, v, v), jnp.float32)
    A = A / jnp.sum(A, axis=1, keepdims=True)                    # adjacency-like
    down_w = jax.random.normal(ks[4], (c_out, c_in), jnp.float32) * np.sqrt(2.0 / c_out)
    return dict(
        wa=wa, wb=wb, wd=wd,
        ba=jnp.zeros((num_subset, ci), jnp.float32),
        bb=jnp.zeros((num_subset, ci), jnp.float32),
        bd=jnp.zeros((num_subset, c_out), jnp.float32),
        A=A, PA=jnp.full((num_subset, v, v), 1e-6, jnp.float32),  # constant_(PA, 1e-6)
        bn_gamma=jnp.full((c_out,), 1e-6, jnp.float32),           # bn_init(self.bn, 1e-6)
        bn_beta=jnp.zeros((c_out,), jnp.float32),
        bn_mean=jnp.zeros((c_out,), jnp.float32),
        bn_var=jnp.ones((c_out,), jnp.float32),
        down_w=down_w, down_b=jnp.zeros((c_out,), jnp.float32),
        down_bn_gamma=jnp.ones((c_out,), jnp.float32),            # bn_init(down bn, 1)
        down_bn_beta=jnp.zeros((c_out,), jnp.float32),
        down_bn_mean=jnp.zeros((c_out,), jnp.float32),
        down_bn_var=jnp.ones((c_out,), jnp.float32),
    )


# --- plain-JAX reference (mirrors the PyTorch forward) ------------------------
def unit_gcn_reference(x, p):
    N, C, Tdim, Vdim = x.shape
    NS, CI, _ = p['wa'].shape
    COUT = p['wd'].shape[1]
    a_tot = p['A'] + p['PA']
    y = jnp.zeros((N, COUT, Tdim, Vdim), jnp.float32)
    for i in range(NS):
        a1 = jnp.einsum('oc,nctv->notv', p['wa'][i], x) + p['ba'][i][None, :, None, None]
        a1 = a1.transpose(0, 3, 1, 2).reshape(N, Vdim, CI * Tdim)
        a2 = (jnp.einsum('oc,nctv->notv', p['wb'][i], x)
              + p['bb'][i][None, :, None, None]).reshape(N, CI * Tdim, Vdim)
        s = jnp.matmul(a1, a2) / (CI * Tdim)
        att = jax.nn.softmax(s, axis=-2) + a_tot[i]
        z = jnp.matmul(x.reshape(N, C * Tdim, Vdim), att).reshape(N, C, Tdim, Vdim)
        z = jnp.einsum('oc,nctv->notv', p['wd'][i], z) + p['bd'][i][None, :, None, None]
        y = y + z
    bn_scale = p['bn_gamma'] / jnp.sqrt(p['bn_var'] + EPS)
    bn_shift = p['bn_beta'] - p['bn_mean'] * bn_scale
    y = y * bn_scale[None, :, None, None] + bn_shift[None, :, None, None]
    if C != COUT:
        d = jnp.einsum('oc,nctv->notv', p['down_w'], x) + p['down_b'][None, :, None, None]
        dsc = p['down_bn_gamma'] / jnp.sqrt(p['down_bn_var'] + EPS)
        dsh = p['down_bn_beta'] - p['down_bn_mean'] * dsc
        d = d * dsc[None, :, None, None] + dsh[None, :, None, None]
    else:
        d = x
    return jnp.maximum(y + d, 0.0)


if __name__ == "__main__":
    key = jax.random.PRNGKey(0)
    pkey, xkey, bkey = jax.random.split(key, 3)

    # config 1: in != out channels (down branch active), module-faithful init
    params = init_params(pkey, C_IN, C_OUT)
    x = jax.random.normal(xkey, (N_BATCH, C_IN, T, V), dtype=jnp.float32)
    out = jax.block_until_ready(unit_gcn_pallas(x, params))
    assert out.shape == (N_BATCH, C_OUT, T, V)
    np.testing.assert_allclose(np.asarray(out), np.asarray(unit_gcn_reference(x, params)),
                               rtol=5e-2, atol=5e-2)

    # config 2: same shapes, "trained-like" BN / nonzero biases so the
    # attention + conv_d path is strongly exercised (not just the residual)
    kb = jax.random.split(bkey, 6)
    params_t = dict(params)
    params_t.update(
        ba=0.1 * jax.random.normal(kb[0], params['ba'].shape, jnp.float32),
        bb=0.1 * jax.random.normal(kb[1], params['bb'].shape, jnp.float32),
        bd=0.1 * jax.random.normal(kb[2], params['bd'].shape, jnp.float32),
        bn_gamma=1.0 + 0.1 * jax.random.normal(kb[3], (C_OUT,), jnp.float32),
        bn_beta=0.1 * jax.random.normal(kb[4], (C_OUT,), jnp.float32),
        bn_mean=0.2 * jax.random.normal(kb[5], (C_OUT,), jnp.float32),
        bn_var=jnp.full((C_OUT,), 1.3, jnp.float32),
    )
    out_t = jax.block_until_ready(unit_gcn_pallas(x, params_t))
    np.testing.assert_allclose(np.asarray(out_t), np.asarray(unit_gcn_reference(x, params_t)),
                               rtol=5e-2, atol=5e-2)

    # config 3: in == out channels -> identity residual path (no down conv)
    pkey2, xkey2 = jax.random.split(jax.random.PRNGKey(1))
    params_id = init_params(pkey2, C_OUT, C_OUT)
    x_id = jax.random.normal(xkey2, (N_BATCH, C_OUT, T, V), dtype=jnp.float32)
    out_id = jax.block_until_ready(unit_gcn_pallas(x_id, params_id))
    np.testing.assert_allclose(np.asarray(out_id),
                               np.asarray(unit_gcn_reference(x_id, params_id)),
                               rtol=5e-2, atol=5e-2)

    print("KERNEL_OK")
</pallas_src>

<mosaic_0001>
module attributes {stable_mosaic.version = 11 : i64} {
  func.func @kernel(%arg0: i32, %arg1: memref<64x32xbf16, #tpu.memory_space<vmem>>, %arg2: memref<4x256xbf16, #tpu.memory_space<vmem>>, %arg3: memref<48x192xbf16, #tpu.memory_space<vmem>>, %arg4: memref<72x192xf32, #tpu.memory_space<vmem>>, %arg5: memref<16x256xf32, #tpu.memory_space<vmem>>) attributes {dimension_semantics = [#tpu.dimension_semantics<arbitrary>], iteration_bounds = array<i64: 1>, scalar_prefetch = 0 : i64, scratch_operands = 0 : i64, tpu.core_type = #tpu.core_type<tc>, window_params = [{pipeline_mode = #tpu.pipeline_mode<synchronous>, transform_indices = @transform_0, window_bounds = array<i64: 64, 32>}, {pipeline_mode = #tpu.pipeline_mode<synchronous>, transform_indices = @transform_1, window_bounds = array<i64: 4, 256>}, {pipeline_mode = #tpu.pipeline_mode<synchronous>, transform_indices = @transform_2, window_bounds = array<i64: 48, 192>}, {pipeline_mode = #tpu.pipeline_mode<synchronous>, transform_indices = @transform_3, window_bounds = array<i64: 72, 192>}, {pipeline_mode = #tpu.pipeline_mode<synchronous>, transform_indices = @transform_4, window_bounds = array<i64: 16, 256>}]} {
    %c0 = arith.constant 0 : index
    %c0_0 = arith.constant 0 : index
    %0 = vector.load %arg1[%c0, %c0_0] : memref<64x32xbf16, #tpu.memory_space<vmem>>, vector<32x32xbf16>
    %c32 = arith.constant 32 : index
    %c0_1 = arith.constant 0 : index
    %1 = vector.load %arg1[%c32, %c0_1] : memref<64x32xbf16, #tpu.memory_space<vmem>>, vector<32x32xbf16>
    %c0_2 = arith.constant 0 : index
    %c0_3 = arith.constant 0 : index
    %2 = vector.load %arg3[%c0_2, %c0_3] : memref<48x192xbf16, #tpu.memory_space<vmem>>, vector<32x192xbf16>
    %c32_4 = arith.constant 32 : index
    %c0_5 = arith.constant 0 : index
    %3 = vector.load %arg3[%c32_4, %c0_5] : memref<48x192xbf16, #tpu.memory_space<vmem>>, vector<16x16xbf16>
    %4 = vector.extract_strided_slice %3 {offsets = [0, 0], sizes = [16, 12], strides = [1, 1]} : vector<16x16xbf16> to vector<16x12xbf16>
    %c0_6 = arith.constant 0 : index
    %c0_7 = arith.constant 0 : index
    %5 = vector.load %arg4[%c0_6, %c0_7] : memref<72x192xf32, #tpu.memory_space<vmem>>, vector<1x192xf32>
    %c8 = arith.constant 8 : index
    %c0_8 = arith.constant 0 : index
    %6 = vector.load %arg4[%c8, %c0_8] : memref<72x192xf32, #tpu.memory_space<vmem>>, vector<16x16xf32>
    %c24 = arith.constant 24 : index
    %c0_9 = arith.constant 0 : index
    %7 = vector.load %arg4[%c24, %c0_9] : memref<72x192xf32, #tpu.memory_space<vmem>>, vector<16x16xf32>
    %c40 = arith.constant 40 : index
    %c0_10 = arith.constant 0 : index
    %8 = vector.load %arg4[%c40, %c0_10] : memref<72x192xf32, #tpu.memory_space<vmem>>, vector<16x16xf32>
    %c56 = arith.constant 56 : index
    %c0_11 = arith.constant 0 : index
    %9 = vector.load %arg4[%c56, %c0_11] : memref<72x192xf32, #tpu.memory_space<vmem>>, vector<16x1xf32>
    %cst = arith.constant dense<0.000000e+00> : vector<32x192xf32>
    %10 = tpu.matmul %1, %2, %cst {dimension_numbers = #tpu.dot_dimension_numbers<[1], [0], [0], [1], [0, 0, 1, 1], [], []>} : vector<32x32xbf16>, vector<32x192xbf16>, vector<32x192xf32> -> vector<32x192xf32>
    %11 = vector.broadcast %5 : vector<1x192xf32> to vector<32x192xf32>
    %12 = arith.addf %10, %11 : vector<32x192xf32>
    %13 = vector.extract_strided_slice %12 {offsets = [0, 0], sizes = [16, 192], strides = [1, 1]} : vector<32x192xf32> to vector<16x192xf32>
    %14 = vector.extract_strided_slice %13 {offsets = [0, 0], sizes = [16, 32], strides = [1, 1]} : vector<16x192xf32> to vector<16x32xf32>
    %15 = vector.extract_strided_slice %13 {offsets = [0, 96], sizes = [16, 32], strides = [1, 1]} : vector<16x192xf32> to vector<16x32xf32>
    %cst_12 = arith.constant dense<0.000000e+00> : vector<16x16xf32>
    %16 = tpu.matmul %14, %15, %cst_12 {dimension_numbers = #tpu.dot_dimension_numbers<[1], [1], [0], [0], [0, 0, 1, 0], [], []>} : vector<16x32xf32>, vector<16x32xf32>, vector<16x16xf32> -> vector<16x16xf32>
    %cst_13 = arith.constant 3.125000e-02 : f32
    %17 = vector.broadcast %cst_13 : f32 to vector<16x16xf32>
    %18 = arith.mulf %16, %17 : vector<16x16xf32>
    %cst_14 = arith.constant dense<0xFF800000> : vector<16xf32>
    %19 = vector.multi_reduction <maximumf>, %18, %cst_14 [0] : vector<16x16xf32> to vector<16xf32>
    %20 = vector.shape_cast %19 : vector<16xf32> to vector<1x16xf32>
    %21 = vector.broadcast %20 : vector<1x16xf32> to vector<16x16xf32>
    %22 = arith.subf %18, %21 : vector<16x16xf32>
    %23 = math.exp %22 : vector<16x16xf32>
    %cst_15 = arith.constant dense<0.000000e+00> : vector<16xf32>
    %24 = vector.multi_reduction <add>, %23, %cst_15 [0] : vector<16x16xf32> to vector<16xf32>
    %25 = vector.shape_cast %24 : vector<16xf32> to vector<1x16xf32>
    %26 = vector.broadcast %25 : vector<1x16xf32> to vector<16x16xf32>
    %27 = arith.divf %23, %26 : vector<16x16xf32>
    %28 = arith.addf %27, %6 : vector<16x16xf32>
    %29 = vector.extract_strided_slice %13 {offsets = [0, 32], sizes = [16, 32], strides = [1, 1]} : vector<16x192xf32> to vector<16x32xf32>
    %30 = vector.extract_strided_slice %13 {offsets = [0, 128], sizes = [16, 32], strides = [1, 1]} : vector<16x192xf32> to vector<16x32xf32>
    %cst_16 = arith.constant dense<0.000000e+00> : vector<16x16xf32>
    %31 = tpu.matmul %29, %30, %cst_16 {dimension_numbers = #tpu.dot_dimension_numbers<[1], [1], [0], [0], [0, 0, 1, 0], [], []>} : vector<16x32xf32>, vector<16x32xf32>, vector<16x16xf32> -> vector<16x16xf32>
    %cst_17 = arith.constant 3.125000e-02 : f32
    %32 = vector.broadcast %cst_17 : f32 to vector<16x16xf32>
    %33 = arith.mulf %31, %32 : vector<16x16xf32>
    %cst_18 = arith.constant dense<0xFF800000> : vector<16xf32>
    %34 = vector.multi_reduction <maximumf>, %33, %cst_18 [0] : vector<16x16xf32> to vector<16xf32>
    %35 = vector.shape_cast %34 : vector<16xf32> to vector<1x16xf32>
    %36 = vector.broadcast %35 : vector<1x16xf32> to vector<16x16xf32>
    %37 = arith.subf %33, %36 : vector<16x16xf32>
    %38 = math.exp %37 : vector<16x16xf32>
    %cst_19 = arith.constant dense<0.000000e+00> : vector<16xf32>
    %39 = vector.multi_reduction <add>, %38, %cst_19 [0] : vector<16x16xf32> to vector<16xf32>
    %40 = vector.shape_cast %39 : vector<16xf32> to vector<1x16xf32>
    %41 = vector.broadcast %40 : vector<1x16xf32> to vector<16x16xf32>
    %42 = arith.divf %38, %41 : vector<16x16xf32>
    %43 = arith.addf %42, %7 : vector<16x16xf32>
    %44 = vector.extract_strided_slice %13 {offsets = [0, 64], sizes = [16, 32], strides = [1, 1]} : vector<16x192xf32> to vector<16x32xf32>
    %45 = vector.extract_strided_slice %13 {offsets = [0, 160], sizes = [16, 32], strides = [1, 1]} : vector<16x192xf32> to vector<16x32xf32>
    %cst_20 = arith.constant dense<0.000000e+00> : vector<16x16xf32>
    %46 = tpu.matmul %44, %45, %cst_20 {dimension_numbers = #tpu.dot_dimension_numbers<[1], [1], [0], [0], [0, 0, 1, 0], [], []>} : vector<16x32xf32>, vector<16x32xf32>, vector<16x16xf32> -> vector<16x16xf32>
    %cst_21 = arith.constant 3.125000e-02 : f32
    %47 = vector.broadcast %cst_21 : f32 to vector<16x16xf32>
    %48 = arith.mulf %46, %47 : vector<16x16xf32>
    %cst_22 = arith.constant dense<0xFF800000> : vector<16xf32>
    %49 = vector.multi_reduction <maximumf>, %48, %cst_22 [0] : vector<16x16xf32> to vector<16xf32>
    %50 = vector.shape_cast %49 : vector<16xf32> to vector<1x16xf32>
    %51 = vector.broadcast %50 : vector<1x16xf32> to vector<16x16xf32>
    %52 = arith.subf %48, %51 : vector<16x16xf32>
    %53 = math.exp %52 : vector<16x16xf32>
    %cst_23 = arith.constant dense<0.000000e+00> : vector<16xf32>
    %54 = vector.multi_reduction <add>, %53, %cst_23 [0] : vector<16x16xf32> to vector<16xf32>
    %55 = vector.shape_cast %54 : vector<16xf32> to vector<1x16xf32>
    %56 = vector.broadcast %55 : vector<1x16xf32> to vector<16x16xf32>
    %57 = arith.divf %53, %56 : vector<16x16xf32>
    %58 = arith.addf %57, %8 : vector<16x16xf32>
    %59 = tpu.concatenate %28, %43, %58 in 1 : vector<16x16xf32>, vector<16x16xf32>, vector<16x16xf32> -> vector<16x48xf32>
    %60 = arith.truncf %59 : vector<16x48xf32> to vector<16x48xbf16>
    %61 = vector.extract_strided_slice %0 {offsets = [0, 0], sizes = [32, 16], strides = [1, 1]} : vector<32x32xbf16> to vector<32x16xbf16>
    %cst_24 = arith.constant dense<0.000000e+00> : vector<32x48xf32>
    %62 = tpu.matmul %61, %60, %cst_24 {dimension_numbers = #tpu.dot_dimension_numbers<[1], [0], [0], [1], [0, 0, 1, 1], [], []>} : vector<32x16xbf16>, vector<16x48xbf16>, vector<32x48xf32> -> vector<32x48xf32>
    %63 = vector.extract_strided_slice %12 {offsets = [16, 0], sizes = [16, 192], strides = [1, 1]} : vector<32x192xf32> to vector<16x192xf32>
    %64 = vector.extract_strided_slice %63 {offsets = [0, 0], sizes = [16, 32], strides = [1, 1]} : vector<16x192xf32> to vector<16x32xf32>
    %65 = vector.extract_strided_slice %63 {offsets = [0, 96], sizes = [16, 32], strides = [1, 1]} : vector<16x192xf32> to vector<16x32xf32>
    %cst_25 = arith.constant dense<0.000000e+00> : vector<16x16xf32>
    %66 = tpu.matmul %64, %65, %cst_25 {dimension_numbers = #tpu.dot_dimension_numbers<[1], [1], [0], [0], [0, 0, 1, 0], [], []>} : vector<16x32xf32>, vector<16x32xf32>, vector<16x16xf32> -> vector<16x16xf32>
    %cst_26 = arith.constant 3.125000e-02 : f32
    %67 = vector.broadcast %cst_26 : f32 to vector<16x16xf32>
    %68 = arith.mulf %66, %67 : vector<16x16xf32>
    %cst_27 = arith.constant dense<0xFF800000> : vector<16xf32>
    %69 = vector.multi_reduction <maximumf>, %68, %cst_27 [0] : vector<16x16xf32> to vector<16xf32>
    %70 = vector.shape_cast %69 : vector<16xf32> to vector<1x16xf32>
    %71 = vector.broadcast %70 : vector<1x16xf32> to vector<16x16xf32>
    %72 = arith.subf %68, %71 : vector<16x16xf32>
    %73 = math.exp %72 : vector<16x16xf32>
    %cst_28 = arith.constant dense<0.000000e+00> : vector<16xf32>
    %74 = vector.multi_reduction <add>, %73, %cst_28 [0] : vector<16x16xf32> to vector<16xf32>
    %75 = vector.shape_cast %74 : vector<16xf32> to vector<1x16xf32>
    %76 = vector.broadcast %75 : vector<1x16xf32> to vector<16x16xf32>
    %77 = arith.divf %73, %76 : vector<16x16xf32>
    %78 = arith.addf %77, %6 : vector<16x16xf32>
    %79 = vector.extract_strided_slice %63 {offsets = [0, 32], sizes = [16, 32], strides = [1, 1]} : vector<16x192xf32> to vector<16x32xf32>
    %80 = vector.extract_strided_slice %63 {offsets = [0, 128], sizes = [16, 32], strides = [1, 1]} : vector<16x192xf32> to vector<16x32xf32>
    %cst_29 = arith.constant dense<0.000000e+00> : vector<16x16xf32>
    %81 = tpu.matmul %79, %80, %cst_29 {dimension_numbers = #tpu.dot_dimension_numbers<[1], [1], [0], [0], [0, 0, 1, 0], [], []>} : vector<16x32xf32>, vector<16x32xf32>, vector<16x16xf32> -> vector<16x16xf32>
    %cst_30 = arith.constant 3.125000e-02 : f32
    %82 = vector.broadcast %cst_30 : f32 to vector<16x16xf32>
    %83 = arith.mulf %81, %82 : vector<16x16xf32>
    %cst_31 = arith.constant dense<0xFF800000> : vector<16xf32>
    %84 = vector.multi_reduction <maximumf>, %83, %cst_31 [0] : vector<16x16xf32> to vector<16xf32>
    %85 = vector.shape_cast %84 : vector<16xf32> to vector<1x16xf32>
    %86 = vector.broadcast %85 : vector<1x16xf32> to vector<16x16xf32>
    %87 = arith.subf %83, %86 : vector<16x16xf32>
    %88 = math.exp %87 : vector<16x16xf32>
    %cst_32 = arith.constant dense<0.000000e+00> : vector<16xf32>
    %89 = vector.multi_reduction <add>, %88, %cst_32 [0] : vector<16x16xf32> to vector<16xf32>
    %90 = vector.shape_cast %89 : vector<16xf32> to vector<1x16xf32>
    %91 = vector.broadcast %90 : vector<1x16xf32> to vector<16x16xf32>
    %92 = arith.divf %88, %91 : vector<16x16xf32>
    %93 = arith.addf %92, %7 : vector<16x16xf32>
    %94 = vector.extract_strided_slice %63 {offsets = [0, 64], sizes = [16, 32], strides = [1, 1]} : vector<16x192xf32> to vector<16x32xf32>
    %95 = vector.extract_strided_slice %63 {offsets = [0, 160], sizes = [16, 32], strides = [1, 1]} : vector<16x192xf32> to vector<16x32xf32>
    %cst_33 = arith.constant dense<0.000000e+00> : vector<16x16xf32>
    %96 = tpu.matmul %94, %95, %cst_33 {dimension_numbers = #tpu.dot_dimension_numbers<[1], [1], [0], [0], [0, 0, 1, 0], [], []>} : vector<16x32xf32>, vector<16x32xf32>, vector<16x16xf32> -> vector<16x16xf32>
    %cst_34 = arith.constant 3.125000e-02 : f32
    %97 = vector.broadcast %cst_34 : f32 to vector<16x16xf32>
    %98 = arith.mulf %96, %97 : vector<16x16xf32>
    %cst_35 = arith.constant dense<0xFF800000> : vector<16xf32>
    %99 = vector.multi_reduction <maximumf>, %98, %cst_35 [0] : vector<16x16xf32> to vector<16xf32>
    %100 = vector.shape_cast %99 : vector<16xf32> to vector<1x16xf32>
    %101 = vector.broadcast %100 : vector<1x16xf32> to vector<16x16xf32>
    %102 = arith.subf %98, %101 : vector<16x16xf32>
    %103 = math.exp %102 : vector<16x16xf32>
    %cst_36 = arith.constant dense<0.000000e+00> : vector<16xf32>
    %104 = vector.multi_reduction <add>, %103, %cst_36 [0] : vector<16x16xf32> to vector<16xf32>
    %105 = vector.shape_cast %104 : vector<16xf32> to vector<1x16xf32>
    %106 = vector.broadcast %105 : vector<1x16xf32> to vector<16x16xf32>
    %107 = arith.divf %103, %106 : vector<16x16xf32>
    %108 = arith.addf %107, %8 : vector<16x16xf32>
    %109 = tpu.concatenate %78, %93, %108 in 1 : vector<16x16xf32>, vector<16x16xf32>, vector<16x16xf32> -> vector<16x48xf32>
    %110 = arith.truncf %109 : vector<16x48xf32> to vector<16x48xbf16>
    %111 = vector.extract_strided_slice %0 {offsets = [0, 16], sizes = [32, 16], strides = [1, 1]} : vector<32x32xbf16> to vector<32x16xbf16>
    %cst_37 = arith.constant dense<0.000000e+00> : vector<32x48xf32>
    %112 = tpu.matmul %111, %110, %cst_37 {dimension_numbers = #tpu.dot_dimension_numbers<[1], [0], [0], [1], [0, 0, 1, 1], [], []>} : vector<32x16xbf16>, vector<16x48xbf16>, vector<32x48xf32> -> vector<32x48xf32>
    %113 = vector.extract_strided_slice %62 {offsets = [0, 0], sizes = [4, 16], strides = [1, 1]} : vector<32x48xf32> to vector<4x16xf32>
    %114 = vector.extract_strided_slice %62 {offsets = [4, 0], sizes = [4, 16], strides = [1, 1]} : vector<32x48xf32> to vector<4x16xf32>
    %115 = vector.extract_strided_slice %62 {offsets = [8, 0], sizes = [4, 16], strides = [1, 1]} : vector<32x48xf32> to vector<4x16xf32>
    %116 = vector.extract_strided_slice %62 {offsets = [12, 0], sizes = [4, 16], strides = [1, 1]} : vector<32x48xf32> to vector<4x16xf32>
    %117 = vector.extract_strided_slice %62 {offsets = [16, 0], sizes = [4, 16], strides = [1, 1]} : vector<32x48xf32> to vector<4x16xf32>
    %118 = vector.extract_strided_slice %62 {offsets = [20, 0], sizes = [4, 16], strides = [1, 1]} : vector<32x48xf32> to vector<4x16xf32>
    %119 = vector.extract_strided_slice %62 {offsets = [24, 0], sizes = [4, 16], strides = [1, 1]} : vector<32x48xf32> to vector<4x16xf32>
    %120 = vector.extract_strided_slice %62 {offsets = [28, 0], sizes = [4, 16], strides = [1, 1]} : vector<32x48xf32> to vector<4x16xf32>
    %121 = vector.extract_strided_slice %112 {offsets = [0, 0], sizes = [4, 16], strides = [1, 1]} : vector<32x48xf32> to vector<4x16xf32>
    %122 = vector.extract_strided_slice %112 {offsets = [4, 0], sizes = [4, 16], strides = [1, 1]} : vector<32x48xf32> to vector<4x16xf32>
    %123 = vector.extract_strided_slice %112 {offsets = [8, 0], sizes = [4, 16], strides = [1, 1]} : vector<32x48xf32> to vector<4x16xf32>
    %124 = vector.extract_strided_slice %112 {offsets = [12, 0], sizes = [4, 16], strides = [1, 1]} : vector<32x48xf32> to vector<4x16xf32>
    %125 = vector.extract_strided_slice %112 {offsets = [16, 0], sizes = [4, 16], strides = [1, 1]} : vector<32x48xf32> to vector<4x16xf32>
    %126 = vector.extract_strided_slice %112 {offsets = [20, 0], sizes = [4, 16], strides = [1, 1]} : vector<32x48xf32> to vector<4x16xf32>
    %127 = vector.extract_strided_slice %112 {offsets = [24, 0], sizes = [4, 16], strides = [1, 1]} : vector<32x48xf32> to vector<4x16xf32>
    %128 = vector.extract_strided_slice %112 {offsets = [28, 0], sizes = [4, 16], strides = [1, 1]} : vector<32x48xf32> to vector<4x16xf32>
    %129 = tpu.concatenate %113, %114, %115, %116, %117, %118, %119, %120, %121, %122, %123, %124, %125, %126, %127, %128 in 1 : vector<4x16xf32>, vector<4x16xf32>, vector<4x16xf32>, vector<4x16xf32>, vector<4x16xf32>, vector<4x16xf32>, vector<4x16xf32>, vector<4x16xf32>, vector<4x16xf32>, vector<4x16xf32>, vector<4x16xf32>, vector<4x16xf32>, vector<4x16xf32>, vector<4x16xf32>, vector<4x16xf32>, vector<4x16xf32> -> vector<4x256xf32>
    %130 = vector.extract_strided_slice %62 {offsets = [0, 16], sizes = [4, 16], strides = [1, 1]} : vector<32x48xf32> to vector<4x16xf32>
    %131 = vector.extract_strided_slice %62 {offsets = [4, 16], sizes = [4, 16], strides = [1, 1]} : vector<32x48xf32> to vector<4x16xf32>
    %132 = vector.extract_strided_slice %62 {offsets = [8, 16], sizes = [4, 16], strides = [1, 1]} : vector<32x48xf32> to vector<4x16xf32>
    %133 = vector.extract_strided_slice %62 {offsets = [12, 16], sizes = [4, 16], strides = [1, 1]} : vector<32x48xf32> to vector<4x16xf32>
    %134 = vector.extract_strided_slice %62 {offsets = [16, 16], sizes = [4, 16], strides = [1, 1]} : vector<32x48xf32> to vector<4x16xf32>
    %135 = vector.extract_strided_slice %62 {offsets = [20, 16], sizes = [4, 16], strides = [1, 1]} : vector<32x48xf32> to vector<4x16xf32>
    %136 = vector.extract_strided_slice %62 {offsets = [24, 16], sizes = [4, 16], strides = [1, 1]} : vector<32x48xf32> to vector<4x16xf32>
    %137 = vector.extract_strided_slice %62 {offsets = [28, 16], sizes = [4, 16], strides = [1, 1]} : vector<32x48xf32> to vector<4x16xf32>
    %138 = vector.extract_strided_slice %112 {offsets = [0, 16], sizes = [4, 16], strides = [1, 1]} : vector<32x48xf32> to vector<4x16xf32>
    %139 = vector.extract_strided_slice %112 {offsets = [4, 16], sizes = [4, 16], strides = [1, 1]} : vector<32x48xf32> to vector<4x16xf32>
    %140 = vector.extract_strided_slice %112 {offsets = [8, 16], sizes = [4, 16], strides = [1, 1]} : vector<32x48xf32> to vector<4x16xf32>
    %141 = vector.extract_strided_slice %112 {offsets = [12, 16], sizes = [4, 16], strides = [1, 1]} : vector<32x48xf32> to vector<4x16xf32>
    %142 = vector.extract_strided_slice %112 {offsets = [16, 16], sizes = [4, 16], strides = [1, 1]} : vector<32x48xf32> to vector<4x16xf32>
    %143 = vector.extract_strided_slice %112 {offsets = [20, 16], sizes = [4, 16], strides = [1, 1]} : vector<32x48xf32> to vector<4x16xf32>
    %144 = vector.extract_strided_slice %112 {offsets = [24, 16], sizes = [4, 16], strides = [1, 1]} : vector<32x48xf32> to vector<4x16xf32>
    %145 = vector.extract_strided_slice %112 {offsets = [28, 16], sizes = [4, 16], strides = [1, 1]} : vector<32x48xf32> to vector<4x16xf32>
    %146 = tpu.concatenate %130, %131, %132, %133, %134, %135, %136, %137, %138, %139, %140, %141, %142, %143, %144, %145 in 1 : vector<4x16xf32>, vector<4x16xf32>, vector<4x16xf32>, vector<4x16xf32>, vector<4x16xf32>, vector<4x16xf32>, vector<4x16xf32>, vector<4x16xf32>, vector<4x16xf32>, vector<4x16xf32>, vector<4x16xf32>, vector<4x16xf32>, vector<4x16xf32>, vector<4x16xf32>, vector<4x16xf32>, vector<4x16xf32> -> vector<4x256xf32>
    %147 = vector.extract_strided_slice %62 {offsets = [0, 32], sizes = [4, 16], strides = [1, 1]} : vector<32x48xf32> to vector<4x16xf32>
    %148 = vector.extract_strided_slice %62 {offsets = [4, 32], sizes = [4, 16], strides = [1, 1]} : vector<32x48xf32> to vector<4x16xf32>
    %149 = vector.extract_strided_slice %62 {offsets = [8, 32], sizes = [4, 16], strides = [1, 1]} : vector<32x48xf32> to vector<4x16xf32>
    %150 = vector.extract_strided_slice %62 {offsets = [12, 32], sizes = [4, 16], strides = [1, 1]} : vector<32x48xf32> to vector<4x16xf32>
    %151 = vector.extract_strided_slice %62 {offsets = [16, 32], sizes = [4, 16], strides = [1, 1]} : vector<32x48xf32> to vector<4x16xf32>
    %152 = vector.extract_strided_slice %62 {offsets = [20, 32], sizes = [4, 16], strides = [1, 1]} : vector<32x48xf32> to vector<4x16xf32>
    %153 = vector.extract_strided_slice %62 {offsets = [24, 32], sizes = [4, 16], strides = [1, 1]} : vector<32x48xf32> to vector<4x16xf32>
    %154 = vector.extract_strided_slice %62 {offsets = [28, 32], sizes = [4, 16], strides = [1, 1]} : vector<32x48xf32> to vector<4x16xf32>
    %155 = vector.extract_strided_slice %112 {offsets = [0, 32], sizes = [4, 16], strides = [1, 1]} : vector<32x48xf32> to vector<4x16xf32>
    %156 = vector.extract_strided_slice %112 {offsets = [4, 32], sizes = [4, 16], strides = [1, 1]} : vector<32x48xf32> to vector<4x16xf32>
    %157 = vector.extract_strided_slice %112 {offsets = [8, 32], sizes = [4, 16], strides = [1, 1]} : vector<32x48xf32> to vector<4x16xf32>
    %158 = vector.extract_strided_slice %112 {offsets = [12, 32], sizes = [4, 16], strides = [1, 1]} : vector<32x48xf32> to vector<4x16xf32>
    %159 = vector.extract_strided_slice %112 {offsets = [16, 32], sizes = [4, 16], strides = [1, 1]} : vector<32x48xf32> to vector<4x16xf32>
    %160 = vector.extract_strided_slice %112 {offsets = [20, 32], sizes = [4, 16], strides = [1, 1]} : vector<32x48xf32> to vector<4x16xf32>
    %161 = vector.extract_strided_slice %112 {offsets = [24, 32], sizes = [4, 16], strides = [1, 1]} : vector<32x48xf32> to vector<4x16xf32>
    %162 = vector.extract_strided_slice %112 {offsets = [28, 32], sizes = [4, 16], strides = [1, 1]} : vector<32x48xf32> to vector<4x16xf32>
    %163 = tpu.concatenate %147, %148, %149, %150, %151, %152, %153, %154, %155, %156, %157, %158, %159, %160, %161, %162 in 1 : vector<4x16xf32>, vector<4x16xf32>, vector<4x16xf32>, vector<4x16xf32>, vector<4x16xf32>, vector<4x16xf32>, vector<4x16xf32>, vector<4x16xf32>, vector<4x16xf32>, vector<4x16xf32>, vector<4x16xf32>, vector<4x16xf32>, vector<4x16xf32>, vector<4x16xf32>, vector<4x16xf32>, vector<4x16xf32> -> vector<4x256xf32>
    %164 = tpu.concatenate %129, %146, %163 in 0 : vector<4x256xf32>, vector<4x256xf32>, vector<4x256xf32> -> vector<12x256xf32>
    %165 = arith.truncf %164 : vector<12x256xf32> to vector<12x256xbf16>
    %cst_38 = arith.constant dense<0.000000e+00> : vector<16x256xf32>
    %166 = tpu.matmul %4, %165, %cst_38 {dimension_numbers = #tpu.dot_dimension_numbers<[1], [0], [0], [1], [0, 0, 1, 1], [], []>} : vector<16x12xbf16>, vector<12x256xbf16>, vector<16x256xf32> -> vector<16x256xf32>
    %167 = vector.extract_strided_slice %3 {offsets = [0, 12], sizes = [16, 4], strides = [1, 1]} : vector<16x16xbf16> to vector<16x4xbf16>
    %c0_39 = arith.constant 0 : index
    %c0_40 = arith.constant 0 : index
    %168 = vector.load %arg2[%c0_39, %c0_40] : memref<4x256xbf16, #tpu.memory_space<vmem>>, vector<4x256xbf16>
    %cst_41 = arith.constant dense<0.000000e+00> : vector<16x256xf32>
    %169 = tpu.matmul %167, %168, %cst_41 {dimension_numbers = #tpu.dot_dimension_numbers<[1], [0], [0], [1], [0, 0, 1, 1], [], []>} : vector<16x4xbf16>, vector<4x256xbf16>, vector<16x256xf32> -> vector<16x256xf32>
    %170 = arith.addf %166, %169 : vector<16x256xf32>
    %171 = vector.broadcast %9 : vector<16x1xf32> to vector<16x256xf32>
    %172 = arith.addf %170, %171 : vector<16x256xf32>
    %cst_42 = arith.constant 0.000000e+00 : f32
    %173 = vector.broadcast %cst_42 : f32 to vector<16x256xf32>
    %174 = arith.maximumf %172, %173 : vector<16x256xf32>
    %c0_43 = arith.constant 0 : index
    %c0_44 = arith.constant 0 : index
    %175 = vector.load %arg5[%c0_43, %c0_44] : memref<16x256xf32, #tpu.memory_space<vmem>>, vector<16x256xf32>
    tpu.vector_store %arg5[%c0_43, %c0_44], %174 {strides = array<i32>} : memref<16x256xf32, #tpu.memory_space<vmem>>, vector<16x256xf32>,
    return
  }
  func.func @transform_0(%arg0: i32) -> (i32, i32) {
    %c0_i32 = arith.constant 0 : i32
    %c0_i32_0 = arith.constant 0 : i32
    %c0_i32_1 = arith.constant 0 : i32
    return %c0_i32, %c0_i32_0 : i32, i32
  }
  func.func @transform_1(%arg0: i32) -> (i32, i32) {
    %c0_i32 = arith.constant 0 : i32
    %c0_i32_0 = arith.constant 0 : i32
    %c0_i32_1 = arith.constant 0 : i32
    return %c0_i32, %c0_i32_0 : i32, i32
  }
  func.func @transform_2(%arg0: i32) -> (i32, i32) {
    %c0_i32 = arith.constant 0 : i32
    %c0_i32_0 = arith.constant 0 : i32
    %c0_i32_1 = arith.constant 0 : i32
    return %c0_i32, %c0_i32_0 : i32, i32
  }
  func.func @transform_3(%arg0: i32) -> (i32, i32) {
    %c0_i32 = arith.constant 0 : i32
    %c0_i32_0 = arith.constant 0 : i32
    %c0_i32_1 = arith.constant 0 : i32
    return %c0_i32, %c0_i32_0 : i32, i32
  }
  func.func @transform_4(%arg0: i32) -> (i32, i32) {
    %c0_i32 = arith.constant 0 : i32
    %c0_i32_0 = arith.constant 0 : i32
    %c0_i32_1 = arith.constant 0 : i32
    return %c0_i32, %c0_i32_0 : i32, i32
  }
}

</mosaic_0001>

<bundles_post_ra>
// kernel: tpu_custom_call.1
= control target key start
LH: loop header
LB: loop body
LE: loop exit
PB: predicated region body
PF: predicated region fallthrough
CT: control target
= control target key end

     0   :  { %9 = vsyncpa [#allocation3], 0  ;;  %s2186_s0 = inlined_call_operand.vmem [shape: bf16[64,32], index: 0, kind: input, shape index: {}]   ;;  %s2187_s1 = inlined_call_operand.hbm [shape: bf16[4,256], index: 1, kind: input, shape index: {}]   ;;  %s2188_s2 = inlined_call_operand.vmem [shape: bf16[48,192], index: 2, kind: input, shape index: {}]   ;;  %s2189_s3 = inlined_call_operand.hbm [shape: f32[72,192], index: 3, kind: input, shape index: {}]   ;;  %s2190_s4 = inlined_call_operand.hbm [shape: f32[16,256], index: 4, kind: output, shape index: {}]  }
   0x1   :  { %10 = vsyncpa [#allocation6], 0 }
   0x2   :  { %11 = vsyncpa [#allocation4], 0  ;;  %s1808_s15 = smov [#allocation2]   ;;  %s1809_s17 = smov [#allocation5]  }
   0x3   :  { %s20_s16 = sshll.u32 %s1808_s15, 4  ;;  %s31_s18 = sshll.u32 %s1809_s17, 4  ;;  %s21_s16 = int_to_ptr.vmem [resolvable:$true] %s20_s16  ;;  %s32_s18 = int_to_ptr.vmem [resolvable:$true] %s31_s18 }
   0x4   :  { %s1750_s19 = scalar_lea.vmem %s21_s16, 64  ;;  %p1755_p1 = scmp.lt.s32.totalorder %s21_s16, %s21_s16 }
   0x5   :  { %p1751_p0 = scmp.ne.s32.totalorder %s21_s16, %s1750_s19  ;;  %p1756_p2 = scmp.lt.s32.totalorder %s1750_s19, %s1750_s19 }
   0x7   :  { %p1757_p3 = por %p1756_p2, %p1755_p1 }
   0x9   :  { %p1758_p4 = pnand %p1757_p3, %p1751_p0 }
   0xb   :  { %1761 = shalt.err (!%p1758_p4)
}
   0xc   :  { %23 = dma.hbm_to_vmem [thread:$0]  %s2187_s1, 64, %s21_s16, [#allocation3]  }
   0xd   :  { %s1770_s22 = scalar_lea.vmem %s32_s18, 2304  ;;  %p1775_p6 = scmp.lt.s32.totalorder %s32_s18, %s32_s18 }
   0xe   :  { %p1771_p5 = scmp.ne.s32.totalorder %s32_s18, %s1770_s22  ;;  %p1776_p7 = scmp.lt.s32.totalorder %s1770_s22, %s1770_s22 }
  0x10   :  { %p1777_p8 = por %p1776_p7, %p1775_p6 }
  0x12   :  { %p1778_p9 = pnand %p1777_p8, %p1771_p5 }
  0x14   :  { %1781 = shalt.err (!%p1778_p9)
}
  0x15   :  { %s1810_s23 = smov 256   ;;  %s1811_s24 = smov 16  }
  0x16   :  { %37 = dma.hbm_to_vmem [thread:$0]  %s2189_s3, 2304, %s32_s18, [#allocation6], %s1810_s23, %s1810_s23, %s1811_s24  }
  0x17   :  { %1802 = dma.done.wait [#allocation3], 64  }
  0x18   :  { %1803 = vsyncadd [#allocation3], 4294967232 }
  0x19   :  { %1804 = dma.done.wait [#allocation6], 2304  }
  0x1a   :  { %1805 = vsyncadd [#allocation6], 4294964992  ;;  %v1812_v0 = vmov 0   ;;  %v1695_v1 = vld [vmem:[%s2188_s2 + $0x14] ss:$8 sps:$4 sm:$0xff]   ;;  %vm109_vm0 = vcmask 261120   ;;  %v69_v6 = vlaneseq }
  0x1b   :  { %148 = vmatprep.mubr.bf16.mxu0 %v1812_v0  ;;  %1694 = vset.pattern.permute.xlu1 %v1812_v0  ;;  %v1697_v2 = vld [vmem:[%s2188_s2 + $0x10] ss:$8 sps:$4 sm:$0xff]   ;;  %v1698_v3 = vld [vmem:[%s2188_s2 + $0x4] ss:$8 sps:$4 sm:$0xff]   ;;  %v1700_v4 = vld [vmem:[%s2188_s2] ss:$8 sps:$4 sm:$0xff]  }
  0x1c   :  { %1693 = vset.pattern.permute.xlu0 %v1812_v0  ;;  %128 = vmatprep.subr.bf16.mxu0 %v1695_v1  ;;  %v1701_v5 = vld [vmem:[%s2186_s0 + $0x10] sm:$0xff]   ;;  %v70_v7 = vshrl.u32 %v69_v6, 7  ;;  %v1702_v8 = vld [vmem:[%s2186_s0 + $0x18] sm:$0xff]   ;;  %v59_v10 = vld [vmem:[#allocation5] ss:$8 sm:$0x3] }
  0x1d   :  { %129 = vmatpush1.bf16.msra.mxu0 %v1697_v2  ;;  %s1813_s11 = smov 96   ;;  %s1814_s12 = smov 32   ;;  %vm260_vm1 = vcmask 130048   ;;  %vm1283_vm2 = vcmask 1041408   ;;  %vm1120_vm3 = vcmask 392192   ;;  %vm1122_vm4 = vcmask 523264  }
  0x1e   :  { %130 = vmatprep.subr.bf16.mxu0 %v1698_v3  ;;  %v71_v9 = vsub.s32 0, %v70_v7  ;;  %v75_v11 = vsub.s32 1, %v70_v7  ;;  %s1815_s13 = smov 64   ;;  %s1817_s18 = smov 48   ;;  %vm1124_vm5 = vcmask 654336   ;;  %vm1126_vm6 = vcmask 785408  }
  0x1f   :  { %s1818_s19 = smov 80   ;;  %s1819_s22 = smov 116   ;;  %vm1128_vm7 = vcmask 916480   ;;  %vm1279_vm8 = vcmask 31744   ;;  %vm1257_vm9 = vcmask 1043456   ;;  %vm1337_vm10 = vcmask 1045504  }
  0x20   :  { %v1879_v12 = vrot.slane %v59_v10, %v71_v9  ;;  %v76_v13 = vrot.slane %v59_v10, %v75_v11  ;;  %vm1333_vm11 = vcmask 97280  }
  0x21   :  { %131 = vmatpush1.bf16.msra.mxu0 %v1700_v4 }
  0x24   :  { %1433 = vmatmul.mubr.msk.bf16.vlgmr.msra.gmra.mxu0 %vm109_vm0, %v1701_v5 }
  0x25   :  { %158 = vmatprep.mubr.bf16.mxu0 %v1812_v0 }
  0x2c   :  { %1434 = vmatmul.mubr.msk.bf16.gmra.mxu0 %vm109_vm0, %v1702_v8 }
  0xe4   :  { %v150_v14 = vpop.f32.mrf.mxu0 }
  0xe5   :  { %v151_v15 = vadd.f32 %v150_v14, %v1879_v12 }
  0xe6   :  { %v152_v16 = vpop.f32.mrf.mxu0 }
  0xe7   :  { %v153_v17 = vadd.f32 %v152_v16, %v76_v13  ;;  %1505 = vmatprep.mubr.msk.f32.mxu1 %vm109_vm0, %v151_v15 }
  0xe8   :  { %v154_v18 = vpop.f32.mrf.mxu0 }
  0xe9   :  { %v155_v19 = vadd.f32 %v154_v18, %v1879_v12  ;;  %414 = vrot.lane.b32.xlu1 %v153_v17, %s1813_s11 }
  0xea   :  { %v156_v20 = vpop.f32.mrf.mxu0 }
  0xeb   :  { %v157_v21 = vadd.f32 %v156_v20, %v76_v13  ;;  %173 = vrot.lane.b32.xlu0 %v155_v19, %s1814_s12 }
  0xec   :  { %v1909_v30 = vpop.f32.mrf.mxu0 }
  0xed   :  { %416 = vrot.lane.b32.xlu1 %v157_v21, %s1813_s11 }
  0xee   :  { %v162_v31 = vpop.f32.mrf.mxu0 }
  0xef   :  { %171 = vrot.lane.b32.xlu0 %v151_v15, %s1814_s12  ;;  %v1913_v34 = vadd.f32 %v162_v31, %v76_v13 }
  0xf0   :  { %v1911_v32 = vpop.f32.mrf.mxu0 }
  0xf1   :  { %292 = vrot.lane.b32.xlu1 %v155_v19, %s1813_s11 }
  0xf2   :  { %v166_v33 = vpop.f32.mrf.mxu0 }
  0xf3   :  { %290 = vrot.lane.b32.xlu0 %v151_v15, %s1813_s11  ;;  %v1915_v35 = vadd.f32 %v166_v33, %v76_v13 }
  0xf5   :  { %412 = vrot.lane.b32.xlu1 %v155_v19, %s1815_s13 }
  0xf7   :  { %410 = vrot.lane.b32.xlu0 %v151_v15, %s1815_s13 }
 0x15b   :  { %v415_v22 = vpop.permute.xlu1 %414 }
 0x15d   :  { %v174_v23 = vpop.permute.xlu0 %173 }
 0x15e   :  { %1501 = vmatprep.subr.msk.mxu1 %vm109_vm0, %v174_v23 }
 0x15f   :  { %1502 = vmatpush3.xpose.msk.msra.mxu1 %vm109_vm0, %v174_v23  ;;  %v417_v24 = vpop.permute.xlu1 %416 }
 0x160   :  { %1515 = vmatprep.subr.msk.mxu0 %vm109_vm0, %v417_v24 }
 0x161   :  { %1516 = vmatpush3.xpose.msk.msra.mxu0 %vm109_vm0, %v417_v24  ;;  %v172_v25 = vpop.permute.xlu0 %171 }
 0x162   :  { %1503 = vmatprep.subr.msk.mxu1 %vm109_vm0, %v172_v25  ;;  %1517 = vmatprep.subr.msk.mxu0 %vm109_vm0, %v415_v22 }
 0x163   :  { %1504 = vmatpush3.xpose.msk.msra.mxu1 %vm109_vm0, %v172_v25  ;;  %v293_v26 = vpop.permute.xlu1 %292 }
 0x164   :  { %1508 = vmatprep.subr.msk.mxu1 %vm109_vm0, %v157_v21 }
 0x165   :  { %1518 = vmatpush3.xpose.msk.msra.mxu0 %vm109_vm0, %v415_v22  ;;  %v291_v27 = vpop.permute.xlu0 %290 }
 0x166   :  { %1506 = vmatmul.mubr.msk.f32.vlgmr.msra.gmra.mxu1 %vm109_vm0, %v155_v19  ;;  %1535 = vmatprep.subr.msk.mxu0 %vm109_vm0, %v1915_v35 }
 0x167   :  { %1509 = vmatpush3.xpose.msk.msra.mxu1 %vm109_vm0, %v157_v21  ;;  %1512 = vmatprep.mubr.msk.f32.mxu1 %vm109_vm0, %v291_v27  ;;  %v413_v29 = vpop.permute.xlu1 %412 }
 0x168   :  { %1510 = vmatprep.subr.msk.mxu1 %vm109_vm0, %v153_v17 }
 0x169   :  { %v411_v28 = vpop.permute.xlu0 %410 }
 0x16a   :  { %1519 = vmatprep.mubr.msk.f32.mxu0 %vm109_vm0, %v411_v28 }
 0x16b   :  { %1511 = vmatpush3.xpose.msk.msra.mxu1 %vm109_vm0, %v153_v17  ;;  %1520 = vmatmul.mubr.msk.f32.vlgmr.msra.gmra.mxu0 %vm109_vm0, %v413_v29 }
 0x16c   :  { %1536 = vmatpush3.xpose.msk.msra.mxu0 %vm109_vm0, %v1915_v35 }
 0x16d   :  { %1537 = vmatprep.subr.msk.mxu0 %vm109_vm0, %v1913_v34 }
 0x16e   :  { %1513 = vmatmul.mubr.msk.f32.vlgmr.msra.gmra.mxu1 %vm109_vm0, %v293_v26 }
 0x170   :  { %1538 = vmatpush3.xpose.msk.msra.mxu0 %vm109_vm0, %v1913_v34 }
 0x226   :  { %v1507_v36 = vpop.f32.mrf.mxu1 }
 0x227   :  { %v259_v37 = vmul.f32 0.03125, %v1507_v36 }
 0x228   :  { %v249_v38 = vpop.f32.mrf.mxu1 }
 0x229   :  { %v258_v39 = vmul.f32 0.03125, %v249_v38  ;;  %v262_v40 = vsel %vm260_vm1, %v259_v37, -inf }
 0x22b   :  { %v261_v41 = vsel %vm260_vm1, %v258_v39, -inf  ;;  %v1521_v42 = vpop.f32.mrf.mxu0 }
 0x22c   :  { %v263_v43 = vmax.f32 %v261_v41, %v262_v40  ;;  %v502_v44 = vmul.f32 0.03125, %v1521_v42 }
 0x22d   :  { %v492_v45 = vpop.f32.mrf.mxu0 }
 0x22e   :  { %v264_v46 = vrot.slane %v263_v43, 4  ;;  %v501_v47 = vmul.f32 0.03125, %v492_v45  ;;  %v1514_v48 = vpop.f32.mrf.mxu1  ;;  %v504_v51 = vsel %vm260_vm1, %v502_v44, -inf }
 0x22f   :  { %v380_v49 = vmul.f32 0.03125, %v1514_v48 }
 0x230   :  { %v265_v50 = vmax.f32 %v263_v43, %v264_v46  ;;  %v503_v52 = vsel %vm260_vm1, %v501_v47, -inf  ;;  %v370_v53 = vpop.f32.mrf.mxu1 }
 0x231   :  { %v505_v54 = vmax.f32 %v503_v52, %v504_v51  ;;  %v379_v55 = vmul.f32 0.03125, %v370_v53  ;;  %v382_v58 = vsel %vm260_vm1, %v380_v49, -inf }
 0x232   :  { %v266_v56 = vrot.slane %v265_v50, 2 }
 0x233   :  { %v506_v57 = vrot.slane %v505_v54, 4  ;;  %v381_v59 = vsel %vm260_vm1, %v379_v55, -inf }
 0x234   :  { %v267_v60 = vmax.f32 %v265_v50, %v266_v56  ;;  %v383_v61 = vmax.f32 %v381_v59, %v382_v58 }
 0x235   :  { %v507_v62 = vmax.f32 %v505_v54, %v506_v57 }
 0x236   :  { %v268_v63 = vrot.slane %v267_v60, 1  ;;  %v384_v1 = vrot.slane %v383_v61, 4 }
 0x237   :  { %v508_v2 = vrot.slane %v507_v62, 2 }
 0x238   :  { %v269_v3 = vmax.f32 %v267_v60, %v268_v63  ;;  %v385_v4 = vmax.f32 %v383_v61, %v384_v1 }
 0x239   :  { %v509_v5 = vmax.f32 %v507_v62, %v508_v2 }
 0x23a   :  { %v270_v6 = vsub.f32 %v258_v39, %v269_v3  ;;  %v271_v7 = vsub.f32 %v259_v37, %v269_v3  ;;  %v386_v8 = vrot.slane %v385_v4, 2  ;;  %v1937_v3 = vld [vmem:[#allocation5 + $0x50] sm:$0xff] }
 0x23b   :  { %v510_v9 = vrot.slane %v509_v5, 1 }
 0x23c   :  { %v272_v10 = vmul.f32 1.442695, %v270_v6  ;;  %v274_v11 = vmul.f32 1.442695, %v271_v7  ;;  %v387_v13 = vmax.f32 %v385_v4, %v386_v8  ;;  %v1939_v4 = vld [vmem:[#allocation5 + $0x60] sm:$0xff] }
 0x23d   :  { %v511_v14 = vmax.f32 %v509_v5, %v510_v9 }
 0x23e   :  { %1706 = vpow2.f32 %v272_v10  ;;  %v388_v15 = vrot.slane %v387_v13, 1  ;;  %v1943_v10 = vld [vmem:[#allocation5 + $0x30] sm:$0xff] }
 0x23f   :  { %1708 = vpow2.f32 %v274_v11  ;;  %v512_v16 = vsub.f32 %v501_v47, %v511_v14  ;;  %v513_v17 = vsub.f32 %v502_v44, %v511_v14  ;;  %v1945_v11 = vld [vmem:[#allocation5 + $0x40] sm:$0xff] }
 0x240   :  { %v389_v18 = vmax.f32 %v387_v13, %v388_v15  ;;  %v1950_v15 = vld [vmem:[%s2186_s0] sm:$0xff]  }
 0x241   :  { %v514_v19 = vmul.f32 1.442695, %v512_v16  ;;  %v516_v20 = vmul.f32 1.442695, %v513_v17  ;;  %1524 = vmatprep.mubr.msk.bf16.mxu1 %vm260_vm1, %v1950_v15 }
 0x242   :  { %v390_v21 = vsub.f32 %v379_v55, %v389_v18  ;;  %v391_v22 = vsub.f32 %v380_v49, %v389_v18 }
 0x243   :  { %1710 = vpow2.f32 %v514_v19 }
 0x244   :  { %1712 = vpow2.f32 %v516_v20  ;;  %v392_v23 = vmul.f32 1.442695, %v390_v21  ;;  %v394_v24 = vmul.f32 1.442695, %v391_v22  ;;  %v161_v20 = vadd.f32 %v1909_v30, %v1879_v12  ;;  %v1972_v22 = vld [vmem:[#allocation5 + $0x10] sm:$0xff] }
 0x245   :  { %v165_v21 = vadd.f32 %v1911_v32, %v1879_v12  ;;  %v1974_v12 = vld [vmem:[#allocation5 + $0x20] sm:$0xff] }
 0x246   :  { %1714 = vpow2.f32 %v392_v23 }
 0x247   :  { %1716 = vpow2.f32 %v394_v24 }
 0x24b   :  { %v1707_v25 = vpop.eup %1706 }
 0x24c   :  { %v1709_v26 = vpop.eup %1708  ;;  %v276_v27 = vsel %vm260_vm1, %v1707_v25, 0.0 }
 0x24d   :  { %v277_v28 = vsel %vm260_vm1, %v1709_v26, 0.0 }
 0x24e   :  { %v278_v29 = vadd.f32 %v277_v28, %v276_v27 }
 0x250   :  { %v1711_v31 = vpop.eup %1710  ;;  %v279_v33 = vrot.slane %v278_v29, 4 }
 0x251   :  { %v1713_v36 = vpop.eup %1712  ;;  %v518_v37 = vsel %vm260_vm1, %v1711_v31, 0.0 }
 0x252   :  { %v280_v38 = vadd.f32 %v279_v33, %v278_v29  ;;  %v519_v39 = vsel %vm260_vm1, %v1713_v36, 0.0 }
 0x253   :  { %v1715_v40 = vpop.eup %1714  ;;  %v520_v41 = vadd.f32 %v519_v39, %v518_v37  ;;  %v1985_v39 = vld [vmem:[%s2186_s0 + $0x8] sm:$0xff]   ;;  %s1816_s0 = smov 112  }
 0x254   :  { %v1717_v42 = vpop.eup %1716  ;;  %v281_v43 = vrot.slane %v280_v38, 2  ;;  %v396_v44 = vsel %vm260_vm1, %v1715_v40, 0.0 }
 0x255   :  { %v521_v45 = vrot.slane %v520_v41, 4  ;;  %v397_v46 = vsel %vm260_vm1, %v1717_v42, 0.0 }
 0x256   :  { %v282_v47 = vadd.f32 %v281_v43, %v280_v38  ;;  %v398_v48 = vadd.f32 %v397_v46, %v396_v44 }
 0x257   :  { %v522_v49 = vadd.f32 %v521_v45, %v520_v41 }
 0x258   :  { %v283_v50 = vrot.slane %v282_v47, 1  ;;  %v399_v51 = vrot.slane %v398_v48, 4 }
 0x259   :  { %v523_v52 = vrot.slane %v522_v49, 2 }
 0x25a   :  { %v284_v53 = vadd.f32 %v283_v50, %v282_v47  ;;  %v400_v54 = vadd.f32 %v399_v51, %v398_v48 }
 0x25b   :  { %v524_v55 = vadd.f32 %v523_v52, %v522_v49 }
 0x25c   :  { %1718 = vrcp.f32 %v284_v53  ;;  %v401_v56 = vrot.slane %v400_v54, 2 }
 0x25d   :  { %v525_v57 = vrot.slane %v524_v55, 1 }
 0x25e   :  { %v402_v58 = vadd.f32 %v401_v56, %v400_v54 }
 0x25f   :  { %v526_v59 = vadd.f32 %v525_v57, %v524_v55 }
 0x260   :  { %v403_v60 = vrot.slane %v402_v58, 1 }
 0x261   :  { %1720 = vrcp.f32 %v526_v59 }
 0x262   :  { %v404_v61 = vadd.f32 %v403_v60, %v402_v58 }
 0x264   :  { %1722 = vrcp.f32 %v404_v61 }
 0x269   :  { %v1719_v62 = vpop.eup %1718 }
 0x26a   :  { %v286_v63 = vmul.f32 %v1719_v62, %v1707_v25  ;;  %v287_v1 = vmul.f32 %v1719_v62, %v1709_v26 }
 0x26e   :  { %v1721_v2 = vpop.eup %1720 }
 0x26f   :  { %v528_v5 = vmul.f32 %v1721_v2, %v1711_v31  ;;  %v529_v6 = vmul.f32 %v1721_v2, %v1713_v36 }
 0x271   :  { %v1723_v7 = vpop.eup %1722  ;;  %v530_v8 = vadd.f32 %v528_v5, %v1937_v3  ;;  %v531_v9 = vadd.f32 %v529_v6, %v1939_v4 }
 0x272   :  { %v406_v13 = vmul.f32 %v1723_v7, %v1715_v40  ;;  %v407_v14 = vmul.f32 %v1723_v7, %v1717_v42 }
 0x273   :  { %v1573_v16 = vpack.i.bf16 %v531_v9, %v530_v8 }
 0x274   :  { %v408_v17 = vadd.f32 %v406_v13, %v1943_v10  ;;  %v409_v18 = vadd.f32 %v407_v14, %v1945_v11 }
 0x275   :  { %1574 = vrot.lane.b32.xlu1 %v1573_v16, %s1814_s12 }
 0x276   :  { %v1568_v19 = vpack.i.bf16 %v409_v18, %v408_v17 }
 0x278   :  { %1569 = vrot.lane.b32.xlu0 %v1568_v19, %s1811_s24 }
 0x279   :  { %620 = vrot.lane.b32.xlu1 %v161_v20, %s1814_s12 }
 0x27c   :  { %622 = vrot.lane.b32.xlu0 %v165_v21, %s1814_s12 }
 0x27d   :  { %862 = vrot.lane.b32.xlu1 %v1913_v34, %s1813_s11  ;;  %v288_v34 = vadd.f32 %v286_v63, %v1972_v22 }
 0x280   :  { %864 = vrot.lane.b32.xlu0 %v1915_v35, %s1813_s11  ;;  %v289_v35 = vadd.f32 %v287_v1, %v1974_v12 }
 0x281   :  { %740 = vrot.lane.b32.xlu1 %v165_v21, %s1813_s11 }
 0x284   :  { %738 = vrot.lane.b32.xlu0 %v161_v20, %s1813_s11 }
 0x285   :  { %860 = vrot.lane.b32.xlu1 %v165_v21, %s1815_s13 }
 0x288   :  { %858 = vrot.lane.b32.xlu0 %v161_v20, %s1815_s13 }
 0x2e7   :  { %v1575_v30 = vpop.permute.xlu1 %1574 }
 0x2e8   :  { %v1577_v26 = vunpack.i.h.bf16 %v1575_v30  ;;  %v1576_v27 = vunpack.i.l.bf16 %v1575_v30 }
 0x2ea   :  { %v1570_v32 = vpop.permute.xlu0 %1569 }
 0x2eb   :  { %v1572_v23 = vunpack.i.h.bf16 %v1570_v32  ;;  %v1571_v24 = vunpack.i.l.bf16 %v1570_v32  ;;  %v621_v25 = vpop.permute.xlu1 %620 }
 0x2ed   :  { %v548_v28 = vsel %vm260_vm1, %v288_v34, %v1571_v24  ;;  %v549_v29 = vsel %vm260_vm1, %v289_v35, %v1572_v23 }
 0x2ee   :  { %v623_v31 = vpop.permute.xlu0 %622  ;;  %v550_v33 = vsel %vm109_vm0, %v548_v28, %v1576_v27  ;;  %v551_v36 = vsel %vm109_vm0, %v549_v29, %v1577_v26 }
 0x2ef   :  { %v552_v37 = vpack.c.bf16 %v551_v36, %v550_v33  ;;  %v863_v38 = vpop.permute.xlu1 %862 }
 0x2f1   :  { %1522 = vmatprep.subr.bf16.mxu1 %v552_v37 }
 0x2f2   :  { %v865_v40 = vpop.permute.xlu0 %864  ;;  %1523 = vmatpush3.bf16.msra.mxu1 %v552_v37 }
 0x2f3   :  { %1528 = vmatprep.subr.msk.mxu1 %vm109_vm0, %v623_v31  ;;  %v741_v42 = vpop.permute.xlu1 %740 }
 0x2f5   :  { %1525 = vmatmul.mubr.msk.bf16.vlgmr.msra.gmra.mxu1 %vm260_vm1, %v1985_v39 }
 0x2f6   :  { %v739_v41 = vpop.permute.xlu0 %738  ;;  %1529 = vmatpush3.xpose.msk.msra.mxu1 %vm109_vm0, %v623_v31  ;;  %1532 = vmatprep.mubr.msk.f32.mxu1 %vm109_vm0, %v161_v20 }
 0x2f7   :  { %1530 = vmatprep.subr.msk.mxu1 %vm109_vm0, %v621_v25  ;;  %1539 = vmatprep.mubr.msk.f32.mxu0 %vm109_vm0, %v739_v41  ;;  %v861_v44 = vpop.permute.xlu1 %860 }
 0x2f8   :  { %1540 = vmatmul.mubr.msk.f32.vlgmr.msra.gmra.mxu0 %vm109_vm0, %v741_v42 }
 0x2fa   :  { %1531 = vmatpush3.xpose.msk.msra.mxu1 %vm109_vm0, %v621_v25  ;;  %v859_v43 = vpop.permute.xlu0 %858 }
 0x2fb   :  { %1542 = vmatprep.subr.msk.mxu1 %vm109_vm0, %v865_v40 }
 0x2fd   :  { %1533 = vmatmul.mubr.msk.f32.vlgmr.msra.gmra.mxu1 %vm109_vm0, %v165_v21 }
 0x2fe   :  { %1543 = vmatpush3.xpose.msk.msra.mxu1 %vm109_vm0, %v865_v40  ;;  %1546 = vmatprep.mubr.msk.f32.mxu1 %vm109_vm0, %v859_v43 }
 0x2ff   :  { %1544 = vmatprep.subr.msk.mxu1 %vm109_vm0, %v863_v38 }
 0x302   :  { %1545 = vmatpush3.xpose.msk.msra.mxu1 %vm109_vm0, %v863_v38 }
 0x305   :  { %1547 = vmatmul.mubr.msk.f32.vlgmr.msra.gmra.mxu1 %vm109_vm0, %v861_v44 }
 0x306   :  { %1322 = vmatprep.mubr.bf16.mxu1 %v1812_v0 }
 0x3b5   :  { %v2004_v45 = vpop.f32.mrf.mxu1 }
 0x3b7   :  { %v2006_v46 = vpop.f32.mrf.mxu1 }
 0x3b8   :  { %v1541_v47 = vpop.f32.mrf.mxu0 }
 0x3b9   :  { %v828_v48 = vmul.f32 0.03125, %v1541_v47  ;;  %v2008_v49 = vpop.f32.mrf.mxu1 }
 0x3ba   :  { %v818_v50 = vpop.f32.mrf.mxu0 }
 0x3bb   :  { %v827_v51 = vmul.f32 0.03125, %v818_v50  ;;  %v2010_v52 = vpop.f32.mrf.mxu1  ;;  %v830_v53 = vsel %vm260_vm1, %v828_v48, -inf }
 0x3bd   :  { %v829_v54 = vsel %vm260_vm1, %v827_v51, -inf  ;;  %v1534_v55 = vpop.f32.mrf.mxu1 }
 0x3be   :  { %v831_v56 = vmax.f32 %v829_v54, %v830_v53  ;;  %v708_v57 = vmul.f32 0.03125, %v1534_v55 }
 0x3bf   :  { %v698_v58 = vpop.f32.mrf.mxu1 }
 0x3c0   :  { %v832_v59 = vrot.slane %v831_v56, 4  ;;  %v707_v60 = vmul.f32 0.03125, %v698_v58  ;;  %v710_v62 = vsel %vm260_vm1, %v708_v57, -inf }
 0x3c2   :  { %v833_v61 = vmax.f32 %v831_v56, %v832_v59  ;;  %v709_v63 = vsel %vm260_vm1, %v707_v60, -inf }
 0x3c3   :  { %v711_v1 = vmax.f32 %v709_v63, %v710_v62 }
 0x3c4   :  { %v834_v2 = vrot.slane %v833_v61, 2 }
 0x3c5   :  { %v712_v5 = vrot.slane %v711_v1, 4  ;;  %v1548_v6 = vpop.f32.mrf.mxu1 }
 0x3c6   :  { %v835_v7 = vmax.f32 %v833_v61, %v834_v2  ;;  %v950_v8 = vmul.f32 0.03125, %v1548_v6 }
 0x3c7   :  { %v713_v9 = vmax.f32 %v711_v1, %v712_v5  ;;  %v940_v13 = vpop.f32.mrf.mxu1 }
 0x3c8   :  { %v836_v14 = vrot.slane %v835_v7, 1  ;;  %v949_v16 = vmul.f32 0.03125, %v940_v13  ;;  %v952_v19 = vsel %vm260_vm1, %v950_v8, -inf }
 0x3c9   :  { %v714_v17 = vrot.slane %v713_v9, 2 }
 0x3ca   :  { %v837_v18 = vmax.f32 %v835_v7, %v836_v14  ;;  %v951_v20 = vsel %vm260_vm1, %v949_v16, -inf }
 0x3cb   :  { %v715_v21 = vmax.f32 %v713_v9, %v714_v17  ;;  %v953_v30 = vmax.f32 %v951_v20, %v952_v19 }
 0x3cc   :  { %v838_v32 = vsub.f32 %v827_v51, %v837_v18  ;;  %v839_v23 = vsub.f32 %v828_v48, %v837_v18 }
 0x3cd   :  { %v716_v24 = vrot.slane %v715_v21, 1  ;;  %v954_v34 = vrot.slane %v953_v30, 4 }
 0x3ce   :  { %v840_v35 = vmul.f32 1.442695, %v838_v32  ;;  %v842_v25 = vmul.f32 1.442695, %v839_v23 }
 0x3cf   :  { %v717_v26 = vmax.f32 %v715_v21, %v716_v24  ;;  %v955_v27 = vmax.f32 %v953_v30, %v954_v34 }
 0x3d0   :  { %1724 = vpow2.f32 %v840_v35 }
 0x3d1   :  { %1726 = vpow2.f32 %v842_v25  ;;  %v718_v28 = vsub.f32 %v707_v60, %v717_v26  ;;  %v719_v29 = vsub.f32 %v708_v57, %v717_v26  ;;  %v956_v31 = vrot.slane %v955_v27, 2 }
 0x3d3   :  { %v720_v33 = vmul.f32 1.442695, %v718_v28  ;;  %v722_v36 = vmul.f32 1.442695, %v719_v29  ;;  %v957_v37 = vmax.f32 %v955_v27, %v956_v31 }
 0x3d5   :  { %1728 = vpow2.f32 %v720_v33  ;;  %v958_v38 = vrot.slane %v957_v37, 1 }
 0x3d6   :  { %1730 = vpow2.f32 %v722_v36 }
 0x3d7   :  { %v959_v40 = vmax.f32 %v957_v37, %v958_v38 }
 0x3d9   :  { %v960_v41 = vsub.f32 %v949_v16, %v959_v40  ;;  %v961_v42 = vsub.f32 %v950_v8, %v959_v40 }
 0x3db   :  { %v962_v43 = vmul.f32 1.442695, %v960_v41  ;;  %v964_v44 = vmul.f32 1.442695, %v961_v42 }
 0x3dd   :  { %v1725_v47 = vpop.eup %1724  ;;  %1732 = vpow2.f32 %v962_v43 }
 0x3de   :  { %v1727_v48 = vpop.eup %1726  ;;  %v844_v50 = vsel %vm260_vm1, %v1725_v47, 0.0  ;;  %1734 = vpow2.f32 %v964_v44 }
 0x3df   :  { %v845_v51 = vsel %vm260_vm1, %v1727_v48, 0.0 }
 0x3e0   :  { %v846_v53 = vadd.f32 %v845_v51, %v844_v50 }
 0x3e2   :  { %v1729_v54 = vpop.eup %1728  ;;  %v847_v55 = vrot.slane %v846_v53, 4 }
 0x3e3   :  { %v1731_v56 = vpop.eup %1730  ;;  %v724_v57 = vsel %vm260_vm1, %v1729_v54, 0.0 }
 0x3e4   :  { %v848_v58 = vadd.f32 %v847_v55, %v846_v53  ;;  %v725_v59 = vsel %vm260_vm1, %v1731_v56, 0.0 }
 0x3e5   :  { %v726_v60 = vadd.f32 %v725_v59, %v724_v57 }
 0x3e6   :  { %v849_v61 = vrot.slane %v848_v58, 2 }
 0x3e7   :  { %v727_v62 = vrot.slane %v726_v60, 4 }
 0x3e8   :  { %v850_v63 = vadd.f32 %v849_v61, %v848_v58  ;;  %v1077_v58 = vrot.slane %v2004_v45, 4 }
 0x3e9   :  { %v728_v1 = vadd.f32 %v727_v62, %v726_v60  ;;  %v1061_v60 = vrot.slane %v2006_v46, 4 }
 0x3ea   :  { %v1733_v2 = vpop.eup %1732  ;;  %v851_v5 = vrot.slane %v850_v63, 1 }
 0x3eb   :  { %v1735_v6 = vpop.eup %1734  ;;  %v729_v7 = vrot.slane %v728_v1, 2  ;;  %v966_v8 = vsel %vm260_vm1, %v1733_v2, 0.0 }
 0x3ec   :  { %v967_v9 = vsel %vm260_vm1, %v1735_v6, 0.0  ;;  %v852_v13 = vadd.f32 %v851_v5, %v850_v63  ;;  %v1085_v5 = vrot.slane %v2008_v49, 4 }
 0x3ed   :  { %v730_v14 = vadd.f32 %v729_v7, %v728_v1  ;;  %v968_v16 = vadd.f32 %v967_v9, %v966_v8  ;;  %v1069_v8 = vrot.slane %v2010_v52, 4  ;;  %v1466_v9 = vld.sshfl [vmem:[#allocation2] sm:$0x33 pattern:$0x76325410] }
 0x3ee   :  { %1736 = vrcp.f32 %v852_v13  ;;  %v1278_v13 = vcombine.high %v1466_v9, %v1466_v9 }
 0x3ef   :  { %v731_v17 = vrot.slane %v730_v14, 1  ;;  %v969_v18 = vrot.slane %v968_v16, 4 }
 0x3f0   :  { %1467 = vmatprep.subr.msk.bf16.mxu1 %vm1283_vm2, %v1278_v13 }
 0x3f1   :  { %v732_v19 = vadd.f32 %v731_v17, %v730_v14  ;;  %v970_v20 = vadd.f32 %v969_v18, %v968_v16  ;;  %v1285_v16 = vsel %vm1283_vm2, %v1466_v9, 0  ;;  %v66_v17 = vld [vmem:[#allocation5 + $0x70] sm:$0xff]  ;;  %v67_v18 = vld [vmem:[#allocation5 + $0x80] sm:$0xff] }
 0x3f2   :  { %1305 = vmatpush1.bf16.msra.mxu1 %v1285_v16 }
 0x3f3   :  { %1738 = vrcp.f32 %v732_v19  ;;  %v971_v21 = vrot.slane %v970_v20, 2 }
 0x3f5   :  { %v972_v30 = vadd.f32 %v971_v21, %v970_v20 }
 0x3f7   :  { %v973_v32 = vrot.slane %v972_v30, 1 }
 0x3f9   :  { %v974_v23 = vadd.f32 %v973_v32, %v972_v30 }
 0x3fb   :  { %v1737_v24 = vpop.eup %1736  ;;  %1740 = vrcp.f32 %v974_v23 }
 0x3fc   :  { %v854_v34 = vmul.f32 %v1737_v24, %v1725_v47  ;;  %v855_v35 = vmul.f32 %v1737_v24, %v1727_v48 }
 0x3fe   :  { %v856_v25 = vadd.f32 %v854_v34, %v1943_v10  ;;  %v857_v26 = vadd.f32 %v855_v35, %v1945_v11 }
 0x400   :  { %v1739_v27 = vpop.eup %1738  ;;  %v1578_v28 = vpack.i.bf16 %v857_v26, %v856_v25 }
 0x401   :  { %v734_v29 = vmul.f32 %v1739_v27, %v1729_v54  ;;  %v735_v31 = vmul.f32 %v1739_v27, %v1731_v56 }
 0x402   :  { %1579 = vrot.lane.b32.xlu0 %v1578_v28, %s1811_s24 }
 0x403   :  { %v737_v44 = vadd.f32 %v735_v31, %v1974_v12 }
 0x406   :  { %1001 = vrot.lane.b32.xlu0 %v1950_v15, %s1816_s0  ;;  %v736_v15 = vadd.f32 %v734_v29, %v1972_v22 }
 0x408   :  { %v1741_v33 = vpop.eup %1740 }
 0x409   :  { %v976_v36 = vmul.f32 %v1741_v33, %v1733_v2  ;;  %v977_v37 = vmul.f32 %v1741_v33, %v1735_v6 }
 0x40b   :  { %v978_v38 = vadd.f32 %v976_v36, %v1937_v3  ;;  %v979_v40 = vadd.f32 %v977_v37, %v1939_v4 }
 0x40d   :  { %v1583_v10 = vpack.i.bf16 %v979_v40, %v978_v38 }
 0x40f   :  { %1584 = vrot.lane.b32.xlu1 %v1583_v10, %s1814_s12 }
 0x413   :  { %1003 = vrot.lane.b32.xlu1 %v1985_v39, %s1816_s0 }
 0x474   :  { %v1580_v11 = vpop.permute.xlu0 %1579 }
 0x475   :  { %v1582_v42 = vunpack.i.h.bf16 %v1580_v11  ;;  %v1581_v43 = vunpack.i.l.bf16 %v1580_v11 }
 0x477   :  { %v996_v4 = vsel %vm260_vm1, %v736_v15, %v1581_v43  ;;  %v997_v50 = vsel %vm260_vm1, %v737_v44, %v1582_v42 }
 0x478   :  { %v1002_v41 = vpop.permute.xlu0 %1001 }
 0x479   :  { %1551 = vmatprep.mubr.msk.bf16.mxu0 %vm260_vm1, %v1002_v41 }
 0x481   :  { %v1585_v47 = vpop.permute.xlu1 %1584 }
 0x482   :  { %v1587_v3 = vunpack.i.h.bf16 %v1585_v47  ;;  %v1586_v48 = vunpack.i.l.bf16 %v1585_v47 }
 0x484   :  { %v998_v51 = vsel %vm109_vm0, %v996_v4, %v1586_v48  ;;  %v999_v39 = vsel %vm109_vm0, %v997_v50, %v1587_v3 }
 0x485   :  { %v1000_v53 = vpack.c.bf16 %v999_v39, %v998_v51  ;;  %v1004_v54 = vpop.permute.xlu1 %1003 }
 0x487   :  { %1549 = vmatprep.subr.bf16.mxu0 %v1000_v53 }
 0x488   :  { %1550 = vmatpush3.bf16.msra.mxu0 %v1000_v53 }
 0x48b   :  { %1552 = vmatmul.mubr.msk.bf16.vlgmr.msra.gmra.mxu0 %vm260_vm1, %v1004_v54 }
 0x48c   :  { %1376 = vmatprep.mubr.bf16.mxu0 %v1812_v0 }
 0x54b   :  { %v1553_v22 = vpop.f32.mrf.mxu0 }
 0x54c   :  { %v1593_v12 = vpack.i.bf16 %v1553_v22, %v2004_v45  ;;  %v1106_v56 = vrot.slane %v1553_v22, 4 }
 0x54d   :  { %v2044_v55 = vpop.f32.mrf.mxu0 }
 0x54e   :  { %1594 = vrot.lane.b32.xlu0 %v1593_v12, %s1815_s13  ;;  %1589 = vrot.lane.b32.xlu1 %v1593_v12, %s1817_s18  ;;  %v1603_v57 = vpack.i.bf16 %v2044_v55, %v2006_v46  ;;  %v1090_v0 = vrot.slane %v2044_v55, 4  ;;  %v1613_v59 = vpack.i.bf16 %v1106_v56, %v1077_v58 }
 0x54f   :  { %v1554_v62 = vpop.f32.mrf.mxu0 }
 0x550   :  { %v1623_v61 = vpack.i.bf16 %v1090_v0, %v1061_v60  ;;  %v1638_v45 = vpack.i.bf16 %v1554_v62, %v2008_v49  ;;  %v1114_v1 = vrot.slane %v1554_v62, 4  ;;  %v2086_v49 = vld [vmem:[%s2188_s2 + $0x20] ss:$8 sps:$4 sm:$0xff]   ;;  %s1820_s2 = smov [#allocation7]  }
 0x551   :  { %v2064_v63 = vpop.f32.mrf.mxu0  ;;  %s1414_s25 = sshll.u32 %s1820_s2, 4  ;;  %s1415_s25 = int_to_ptr.vmem [resolvable:$true] %s1414_s25 }
 0x552   :  { %1599 = vrot.lane.b32.xlu1 %v1593_v12, %s1814_s12  ;;  %1604 = vrot.lane.b32.xlu0 %v1603_v57, %s1816_s0  ;;  %v1648_v2 = vpack.i.bf16 %v2064_v63, %v2010_v52  ;;  %v1098_v6 = vrot.slane %v2064_v63, 4  ;;  %v1653_v7 = vpack.i.bf16 %v1114_v1, %v1085_v5  ;;  %s1782_s26 = scalar_lea.vmem %s1415_s25, 512  ;;  %p1787_p11 = scmp.lt.s32.totalorder %s1415_s25, %s1415_s25 }
 0x553   :  { %p1783_p10 = scmp.ne.s32.totalorder %s1415_s25, %s1782_s26  ;;  %p1788_p12 = scmp.lt.s32.totalorder %s1782_s26, %s1782_s26 }
 0x554   :  { %v1658_v14 = vpack.i.bf16 %v1098_v6, %v1069_v8 }
 0x555   :  { %p1789_p13 = por %p1788_p12, %p1787_p11 }
 0x556   :  { %1614 = vrot.lane.b32.xlu1 %v1613_v59, %s1815_s13  ;;  %1609 = vrot.lane.b32.xlu0 %v1603_v57, %s1813_s11 }
 0x557   :  { %p1790_p0 = pnand %p1789_p13, %p1783_p10 }
 0x55a   :  { %1619 = vrot.lane.b32.xlu1 %v1613_v59, %s1818_s19  ;;  %1624 = vrot.lane.b32.xlu0 %v1623_v61, %s1811_s24 }
 0x55e   :  { %1629 = vrot.lane.b32.xlu1 %v1623_v61, %s1816_s0  ;;  %1639 = vrot.lane.b32.xlu0 %v1638_v45, %s1813_s11 }
 0x562   :  { %1634 = vrot.lane.b32.xlu1 %v1638_v45, %s1818_s19  ;;  %1649 = vrot.lane.b32.xlu0 %v1648_v2, %s1814_s12 }
 0x566   :  { %1654 = vrot.lane.b32.xlu0 %v1653_v7, %s1813_s11  ;;  %1644 = vrot.lane.b32.xlu1 %v1648_v2, %s1811_s24 }
 0x56a   :  { %1669 = vrot.lane.b32.xlu0 %v1653_v7, %s1816_s0  ;;  %1659 = vrot.lane.b32.xlu1 %v1658_v14, %s1814_s12 }
 0x56e   :  { %1679 = vrot.lane.b32.xlu0 %v1658_v14, %s1817_s18  ;;  %1664 = vrot.lane.b32.xlu1 %v1613_v59, %s1817_s18 }
 0x572   :  { %1684 = vrot.lane.b32.xlu0 %v1658_v14, %s1811_s24  ;;  %1674 = vrot.lane.b32.xlu1 %v1638_v45, %s1815_s13 }
 0x576   :  { %1689 = vrot.lane.b32.xlu0 %v1653_v7, %s1818_s19  ;;  %1268 = vrot.lane.b32.xlu1 %v2086_v49, %s1819_s22 }
 0x57a   :  { %1389 = vperm.xlu0 %1693, %v66_v17   ;;  %1394 = vperm.xlu1 %1694, %v67_v18  }
 0x5c0   :  { %v2090_v19 = vpop.permute.xlu0 %1594  ;;  %v2092_v20 = vpop.permute.xlu1 %1589 }
 0x5c1   :  { %v1597_v31 = vunpack.i.h.bf16 %v2090_v19  ;;  %v1596_v33 = vunpack.i.l.bf16 %v2090_v19  ;;  %v1592_v38 = vunpack.i.h.bf16 %v2092_v20  ;;  %v1591_v40 = vunpack.i.l.bf16 %v2092_v20 }
 0x5c4   :  { %v2094_v21 = vpop.permute.xlu1 %1599  ;;  %v1605_v30 = vpop.permute.xlu0 %1604 }
 0x5c5   :  { %v1607_v28 = vunpack.i.h.bf16 %v1605_v30  ;;  %v1606_v29 = vunpack.i.l.bf16 %v1605_v30  ;;  %v1602_v10 = vunpack.i.h.bf16 %v2094_v21  ;;  %v1601_v11 = vunpack.i.l.bf16 %v2094_v21 }
 0x5c7   :  { %v1181_v3 = vsel %vm260_vm1, %v1606_v29, %v1061_v60  ;;  %v1188_v48 = vsel %vm260_vm1, %v1607_v28, %v1090_v0 }
 0x5c8   :  { %v2096_v32 = vpop.permute.xlu1 %1614  ;;  %v1610_v23 = vpop.permute.xlu0 %1609 }
 0x5c9   :  { %v1612_v41 = vunpack.i.h.bf16 %v1610_v23  ;;  %v1611_v42 = vunpack.i.l.bf16 %v1610_v23  ;;  %v1617_v4 = vunpack.i.h.bf16 %v2096_v32  ;;  %v1616_v50 = vunpack.i.l.bf16 %v2096_v32 }
 0x5cc   :  { %v2098_v24 = vpop.permute.xlu1 %1619  ;;  %v1625_v34 = vpop.permute.xlu0 %1624 }
 0x5cd   :  { %v1627_v43 = vunpack.i.h.bf16 %v1625_v34  ;;  %v1626_v15 = vunpack.i.l.bf16 %v1625_v34  ;;  %v1622_v22 = vunpack.i.h.bf16 %v2098_v24  ;;  %v1621_v12 = vunpack.i.l.bf16 %v2098_v24 }
 0x5cf   :  { %v1130_v58 = vsel %vm260_vm1, %v2044_v55, %v1627_v43  ;;  %v1118_v0 = vsel %vm260_vm1, %v2006_v46, %v1626_v15 }
 0x5d0   :  { %v1630_v35 = vpop.permute.xlu1 %1629  ;;  %v2100_v25 = vpop.permute.xlu0 %1639 }
 0x5d1   :  { %v1632_v36 = vunpack.i.h.bf16 %v1630_v35  ;;  %v1631_v37 = vunpack.i.l.bf16 %v1630_v35  ;;  %v1642_v59 = vunpack.i.h.bf16 %v2100_v25  ;;  %v1641_v60 = vunpack.i.l.bf16 %v2100_v25 }
 0x5d3   :  { %v1244_v51 = vsel %vm260_vm1, %v1612_v41, %v1632_v36  ;;  %v1237_v39 = vsel %vm260_vm1, %v1611_v42, %v1631_v37 }
 0x5d4   :  { %v2102_v26 = vpop.permute.xlu1 %1634  ;;  %v1650_v27 = vpop.permute.xlu0 %1649  ;;  %v1238_v2 = vsel %vm109_vm0, %v1237_v39, %v2010_v52  ;;  %v1245_v5 = vsel %vm109_vm0, %v1244_v51, %v2064_v63 }
 0x5d5   :  { %v1652_v56 = vunpack.i.h.bf16 %v1650_v27  ;;  %v1651_v57 = vunpack.i.l.bf16 %v1650_v27  ;;  %v1637_v6 = vunpack.i.h.bf16 %v2102_v26  ;;  %v1636_v55 = vunpack.i.l.bf16 %v2102_v26 }
 0x5d7   :  { %v1131_v8 = vsel %vm109_vm0, %v1130_v58, %v1652_v56  ;;  %v1119_v9 = vsel %vm109_vm0, %v1118_v0, %v1651_v57 }
 0x5d8   :  { %v1655_v44 = vpop.permute.xlu0 %1654  ;;  %v1645_v47 = vpop.permute.xlu1 %1644 }
 0x5d9   :  { %v1647_v53 = vunpack.i.h.bf16 %v1645_v47  ;;  %v1646_v54 = vunpack.i.l.bf16 %v1645_v47  ;;  %v1657_v14 = vunpack.i.h.bf16 %v1655_v44  ;;  %v1656_v16 = vunpack.i.l.bf16 %v1655_v44 }
 0x5db   :  { %v1189_v46 = vsel %vm109_vm0, %v1188_v48, %v1647_v53  ;;  %v1182_v7 = vsel %vm109_vm0, %v1181_v3, %v1646_v54 }
 0x5dc   :  { %v1670_v61 = vpop.permute.xlu0 %1669  ;;  %v1660_v62 = vpop.permute.xlu1 %1659 }
 0x5dd   :  { %v1662_v45 = vunpack.i.h.bf16 %v1660_v62  ;;  %v1661_v1 = vunpack.i.l.bf16 %v1660_v62  ;;  %v1672_v34 = vunpack.i.h.bf16 %v1670_v61  ;;  %v1671_v35 = vunpack.i.l.bf16 %v1670_v61 }
 0x5df   :  { %v1190_v13 = vsel %vm1120_vm3, %v1189_v46, %v1662_v45  ;;  %v1183_v52 = vsel %vm1120_vm3, %v1182_v7, %v1661_v1 }
 0x5e0   :  { %v1191_v63 = vsel %vm1122_vm4, %v1190_v13, %v1592_v38  ;;  %v1184_v17 = vsel %vm1122_vm4, %v1183_v52, %v1591_v40  ;;  %v1680_v18 = vpop.permute.xlu0 %1679  ;;  %v1665_v20 = vpop.permute.xlu1 %1664 }
 0x5e1   :  { %v1192_v30 = vsel %vm1124_vm5, %v1191_v63, %v1617_v4  ;;  %v1185_v32 = vsel %vm1124_vm5, %v1184_v17, %v1616_v50  ;;  %v1682_v23 = vunpack.i.h.bf16 %v1680_v18  ;;  %v1681_v24 = vunpack.i.l.bf16 %v1680_v18 }
 0x5e2   :  { %v1193_v25 = vsel %vm1126_vm6, %v1192_v30, %v1637_v6  ;;  %v1186_v26 = vsel %vm1126_vm6, %v1185_v32, %v1636_v55  ;;  %v1667_v40 = vunpack.i.h.bf16 %v1665_v20  ;;  %v1666_v41 = vunpack.i.l.bf16 %v1665_v20 }
 0x5e3   :  { %v1132_v27 = vsel %vm1120_vm3, %v1131_v8, %v1682_v23  ;;  %v1121_v28 = vsel %vm1120_vm3, %v1119_v9, %v1681_v24  ;;  %v1194_v29 = vsel %vm1128_vm7, %v1193_v25, %v1657_v14  ;;  %v1187_v36 = vsel %vm1128_vm7, %v1186_v26, %v1656_v16 }
 0x5e4   :  { %v1133_v37 = vsel %vm1122_vm4, %v1132_v27, %v1597_v31  ;;  %v1123_v38 = vsel %vm1122_vm4, %v1121_v28, %v1596_v33  ;;  %v1685_v42 = vpop.permute.xlu0 %1684  ;;  %v1675_v43 = vpop.permute.xlu1 %1674  ;;  %v1254_v4 = vrot.slane %v1194_v29, 4  ;;  %v1253_v31 = vrot.slane %v1187_v36, 4 }
 0x5e5   :  { %v1134_v15 = vsel %vm1124_vm5, %v1133_v37, %v1622_v22  ;;  %v1125_v44 = vsel %vm1124_vm5, %v1123_v38, %v1621_v12  ;;  %v1687_v47 = vunpack.i.h.bf16 %v1685_v42  ;;  %v1686_v3 = vunpack.i.l.bf16 %v1685_v42 }
 0x5e6   :  { %v1135_v48 = vsel %vm1126_vm6, %v1134_v15, %v1642_v59  ;;  %v1127_v50 = vsel %vm1126_vm6, %v1125_v44, %v1641_v60  ;;  %v1677_v51 = vunpack.i.h.bf16 %v1675_v43  ;;  %v1676_v39 = vunpack.i.l.bf16 %v1675_v43 }
 0x5e7   :  { %v1246_v19 = vsel %vm1120_vm3, %v1245_v5, %v1687_v47  ;;  %v1239_v33 = vsel %vm1120_vm3, %v1238_v2, %v1686_v3  ;;  %v1136_v12 = vsel %vm1128_vm7, %v1135_v48, %v1672_v34  ;;  %v1129_v56 = vsel %vm1128_vm7, %v1127_v50, %v1671_v35 }
 0x5e8   :  { %v1247_v53 = vsel %vm1122_vm4, %v1246_v19, %v1602_v10  ;;  %v1240_v54 = vsel %vm1122_vm4, %v1239_v33, %v1601_v11  ;;  %v1690_v22 = vpop.permute.xlu0 %1689  ;;  %v1269_v57 = vpop.permute.xlu1 %1268  ;;  %v1259_v62 = vsel %vm1257_vm9, %v1136_v12, %v1254_v4  ;;  %v1258_v45 = vsel %vm1257_vm9, %v1129_v56, %v1253_v31 }
 0x5e9   :  { %v1241_v58 = vsel %vm1124_vm5, %v1240_v54, %v1666_v41  ;;  %v1248_v0 = vsel %vm1124_vm5, %v1247_v53, %v1667_v40  ;;  %v1692_v59 = vunpack.i.h.bf16 %v1690_v22  ;;  %v1691_v60 = vunpack.i.l.bf16 %v1690_v22  ;;  %1468 = vmatmul.mubr.msk.bf16.vlgmr.msra.gmra.mxu1 %vm1279_vm8, %v1269_v57 }
 0x5ea   :  { %v1242_v10 = vsel %vm1126_vm6, %v1241_v58, %v1676_v39  ;;  %v1249_v21 = vsel %vm1126_vm6, %v1248_v0, %v1677_v51 }
 0x5eb   :  { %v1243_v11 = vsel %vm1128_vm7, %v1242_v10, %v1691_v60  ;;  %v1250_v61 = vsel %vm1128_vm7, %v1249_v21, %v1692_v59 }
 0x5ec   :  { %v1261_v1 = vpack.c.bf16 %v1250_v61, %v1259_v62  ;;  %v1260_v2 = vpack.c.bf16 %v1243_v11, %v1258_v45 }
 0x5ee   :  { %1469 = vmatprep.subr.msk.bf16.mxu0 %vm1337_vm10, %v1261_v1  ;;  %v1339_v5 = vsel %vm1337_vm10, %v1260_v2, 0 }
 0x5ef   :  { %1359 = vmatpush1.bf16.msra.mxu0 %v1339_v5 }
 0x5f2   :  { %1470 = vmatmul.mubr.msk.bf16.vlgmr.msra.gmra.mxu0 %vm1333_vm11, %v2086_v49 }
 0x5f5   :  { %v1390_v7 = vpop.permute.xlu0 %1389  ;;  %v1395_v63 = vpop.permute.xlu1 %1394 }
 0x6a9   :  { %v1324_v6 = vpop.f32.mrf.mxu1 }
 0x6ab   :  { %v1326_v55 = vpop.f32.mrf.mxu1 }
 0x6ad   :  { %v1328_v13 = vpop.f32.mrf.mxu1 }
 0x6af   :  { %v1330_v30 = vpop.f32.mrf.mxu1 }
 0x6b2   :  { %v1378_v46 = vpop.f32.mrf.mxu0 }
 0x6b3   :  { %v1379_v8 = vadd.f32 %v1378_v46, %v1324_v6 }
 0x6b4   :  { %v1380_v9 = vpop.f32.mrf.mxu0 }
 0x6b5   :  { %v1381_v52 = vadd.f32 %v1380_v9, %v1326_v55  ;;  %v1397_v14 = vadd.f32 %v1390_v7, %v1379_v8 }
 0x6b6   :  { %v1382_v16 = vpop.f32.mrf.mxu0 }
 0x6b7   :  { %v1383_v17 = vadd.f32 %v1382_v16, %v1328_v13  ;;  %v1398_v18 = vadd.f32 %v1390_v7, %v1381_v52  ;;  %v1401_v20 = vmax.f32 %v1397_v14, 0.0 }
 0x6b8   :  { %v1384_v32 = vpop.f32.mrf.mxu0 }
 0x6b9   :  { %v1385_v23 = vadd.f32 %v1384_v32, %v1330_v30  ;;  %v1402_v24 = vmax.f32 %v1398_v18, 0.0  ;;  %1405 = vst [vmem:[#allocation7] sm:$0xff] %v1401_v20  ;;  %v1399_v49 = vadd.f32 %v1395_v63, %v1383_v17 }
 0x6bb   :  { %1406 = vst [vmem:[#allocation7 + $0x8] sm:$0xff] %v1402_v24  ;;  %v1400_v34 = vadd.f32 %v1395_v63, %v1385_v23  ;;  %v1403_v35 = vmax.f32 %v1399_v49, 0.0 }
 0x6bd   :  { %v1404_v25 = vmax.f32 %v1400_v34, 0.0  ;;  %1407 = vst [vmem:[#allocation7 + $0x10] sm:$0xff] %v1403_v35 }
 0x6bf   :  { %1408 = vst [vmem:[#allocation7 + $0x18] sm:$0xff] %v1404_v25 }
 0x6c0   :  { %1793 = shalt.err (!%p1790_p0)
}
 0x6c1   :  { %1420 = dma.vmem_to_hbm [thread:$0]  %s1415_s25, 512, %s2190_s4, [#allocation4], %s1810_s23, %s1810_s23, %s1811_s24  }
 0x6c2   :  { %1806 = dma.done.wait [#allocation4], 512  }
 0x6c3   :  { %1807 = vsyncadd [#allocation4], 4294966784 }
 0x6c4   :  { %1424 = vsyncpa [#allocation3], 1 }
 0x6c5   :  { %1425 = vsyncpa [#allocation6], 1 }
 0x6c6   :  { %1426 = vsyncpa [#allocation4], 1 }

</bundles_post_ra>
